<compile_context>
chip_gen: v6e
topology: v6e:2x2x1
jax: 0.10.0
libtpu: 0.0.40
codegen_flags: <defaults>
</compile_context>

<pallas_src>
import functools

import jax
import jax.numpy as jnp
from jax.experimental import pallas as pl
from jax.experimental.pallas import tpu as pltpu


# ----------------------------------------------------------------------------
# Fused kernel: one (batch, row-band) grid step.
#   w_ref  : (CT, Cin)          rows = [wq.T ; wk.T ; W_off0.T ; ... ; W_off{KK-1}.T]
#                               where W_off = sum_i emb[i, off] * wv[i]  (emb fold)
#   x_ref  : (1, 1, Cin, band)  padded-input band, flat spatial on lanes
#   o_ref  : (1, 1, C,   L)     output band, L = rows_per_band * Wp (lane-dense)
#   qkv_ref: VMEM scratch (CT, band)
# ----------------------------------------------------------------------------
def _fused_local_attention_kernel(w_ref, x_ref, o_ref, qkv_ref, *,
                                  K, C, Wp, pad, L, CL):
    # Fused q / k / emb-folded-value 1x1 convolutions for this band on the MXU:
    #   (CT, Cin) @ (Cin, band) -> (CT, band), f32.
    qkv_ref[...] = jnp.dot(w_ref[...], x_ref[0, 0],
                           preferred_element_type=jnp.float32,
                           precision=jax.lax.Precision.HIGHEST)

    base = pad * (Wp + 1)                       # q offset of this band's 1st output
    offs = [ka * Wp + kb for ka in range(K) for kb in range(K)]

    def attend(s, cl):
        """Windowed softmax attention on output lanes [s, s+cl) of the band."""
        q = qkv_ref[pl.ds(0, C), pl.ds(base + s, cl)]

        # ---- pass 1: max logit over the K*K window offsets -------------------
        m_run = None
        for off in offs:
            logit = q * qkv_ref[pl.ds(C, C), pl.ds(off + s, cl)]
            m_run = logit if m_run is None else jnp.maximum(m_run, logit)

        # ---- pass 2: one exp per offset; accumulate denom & pre-mixed value --
        l_acc = None
        acc = None
        for idx, off in enumerate(offs):
            p = jnp.exp(q * qkv_ref[pl.ds(C, C), pl.ds(off + s, cl)] - m_run)
            v_sl = qkv_ref[pl.ds((2 + idx) * C, C), pl.ds(off + s, cl)]
            l_acc = p if l_acc is None else l_acc + p
            acc = p * v_sl if acc is None else acc + p * v_sl

        # EUP reciprocal + one Newton step: off the VALU path, f32-tight result.
        r = pl.reciprocal(l_acc, approx=True)
        r = r * (2.0 - l_acc * r)
        o_ref[0, 0, :, pl.ds(s, cl)] = (acc * r).astype(o_ref.dtype)

    # Lane-chunk the elementwise work so big bands don't spill the vreg file.
    n_full, rem = divmod(L, CL)
    if n_full <= 1:
        # Small band: fully static slices (the common / demo path).
        if n_full == 1:
            attend(0, CL)
    else:
        def body(ci, carry):
            attend(ci * CL, CL)
            return carry
        jax.lax.fori_loop(0, n_full, body, 0)
    if rem:
        attend(n_full * CL, rem)                # static tail chunk


# ----------------------------------------------------------------------------
# Shared parameter-only math (identical op sequence for kernel and reference)
# ----------------------------------------------------------------------------
def _softmaxed_emb(params, K, m):
    emb_a = jnp.einsum("mc,ca->ma", params["emb_mix"], params["emb_a"],
                       precision=jax.lax.Precision.HIGHEST)
    emb_b = jnp.einsum("mc,cb->mb", params["emb_mix"], params["emb_b"],
                       precision=jax.lax.Precision.HIGHEST)
    emb = emb_a[:, :, None] + emb_b[:, None, :]                 # (m, K, K)
    return jax.nn.softmax(emb.reshape(m, K * K), axis=0)        # (m, K*K)


# ----------------------------------------------------------------------------
# Parameter init (deterministic, mirrors reset_parameters() shapes / scales)
# ----------------------------------------------------------------------------
def init_params(key, in_channels, out_channels, kernel_size, groups=1, m=4):
    assert out_channels % groups == 0
    kq, kk, kv, ka, kb, kmix = jax.random.split(key, 6)
    # kaiming_normal_(mode='fan_out', relu) for a 1x1 conv: std = sqrt(2/out_ch)
    std = (2.0 / out_channels) ** 0.5
    wq = jax.random.normal(kq, (in_channels, out_channels), jnp.float32) * std
    wk = jax.random.normal(kk, (in_channels, out_channels), jnp.float32) * std
    wv = jax.random.normal(kv, (m, in_channels, out_channels), jnp.float32) * std
    emb_a = jax.random.normal(ka, (out_channels // groups, kernel_size), jnp.float32)
    emb_b = jax.random.normal(kb, (out_channels // groups, kernel_size), jnp.float32)
    emb_mix = jax.random.normal(kmix, (m, out_channels // groups), jnp.float32)
    return dict(wq=wq, wk=wk, wv=wv, emb_a=emb_a, emb_b=emb_b, emb_mix=emb_mix)


# ----------------------------------------------------------------------------
# Forward wrapper
# ----------------------------------------------------------------------------
def self_attention_forward(x_nchw, params, *, kernel_size, stride=1, padding=0,
                           groups=1, m=4, vmem_budget_bytes=24 * 1024 * 1024,
                           lane_chunk=512):
    if stride != 1:
        # TODO(synk): stride > 1 breaks the flat-shift window trick (strided
        # lanes); a strided-slice fallback kernel would be needed.
        raise NotImplementedError("only stride=1 is supported")

    wq, wk, wv = params["wq"], params["wk"], params["wv"]
    B, Cin, H, W = x_nchw.shape
    Cout = wq.shape[1]
    K = kernel_size
    KK = K * K
    assert Cout % groups == 0
    Hp, Wp = H + 2 * padding, W + 2 * padding
    # Same validity condition the PyTorch unfold+crop relies on.  It also keeps
    # the flat-shift lane wraparound confined to columns that the final W crop
    # removes; do NOT relax it.
    assert Hp - K + 1 >= H and Wp - K + 1 >= W, "padding too small for kernel_size"

    # ---- emb softmax + fold into the value conv weights (runs on parameters) ----
    emb = _softmaxed_emb(params, K, m)                           # (m, KK)
    # W_off[i, o] = sum_m emb[m, off] * wv[m, i, o]   (exact f32 elementwise fold)
    w_voff = jnp.sum(emb[:, :, None, None] * wv[:, None, :, :], axis=0)  # (KK,Cin,Cout)
    w_v_t = jnp.transpose(w_voff, (0, 2, 1)).reshape(KK * Cout, Cin)
    w_cat_t = jnp.concatenate([wq.T, wk.T, w_v_t], axis=0).astype(jnp.float32)
    CT = (2 + KK) * Cout                                         # rows of w_cat_t

    max_off = max(padding, K - 1) * (Wp + 1)     # largest in-band read offset

    # ---- row-band tiling under a per-chip-safe VMEM budget ----------------------
    # Double-buffered per-step footprint ~ (2*Cin + 2*Cout + CT) * band * 4 B.
    bytes_per_row = (2 * Cin + 2 * Cout + CT) * Wp * 4
    fixed_bytes = (2 * Cin + CT) * max_off * 4 + 2 * CT * Cin * 4
    th_budget = max(8, (vmem_budget_bytes - fixed_bytes) // max(1, bytes_per_row))
    if H <= th_budget:
        TH, T = H, 1                              # whole image per band (common case)
    else:
        TH = max(8, (th_budget // 8) * 8)         # pad H up instead of shrinking TH
        T = -(-H // TH)
    if B * T < 2 and H >= 16:
        # Keep >= 2 independent grid blocks so v7x's two TensorCores both get work.
        T = 2
        TH = -(-H // 2)
    H_rows = T * TH                               # output rows computed (>=H; cropped)
    L = TH * Wp                                   # lane-dense output width per band
    CL = max(1, min(L, lane_chunk))               # lane chunk (bounds live vregs)

    # Bottom-pad so every in-band read (q offset and window shifts) stays in range.
    need_rows = H_rows + (-(-max_off // Wp))
    Hpf = max(Hp, need_rows)
    x = x_nchw.astype(jnp.float32)
    xp = jnp.pad(x, ((0, 0), (0, 0),
                     (padding, Hpf - H - padding), (padding, padding)))
    xp_flat = xp.reshape(B, Cin, Hpf * Wp)

    if T == 1:
        band = Hpf * Wp
        x_in = xp_flat.reshape(B, 1, Cin, band)   # no extra copy beyond the pad
    else:
        band = L + max_off
        # TODO(synk): for very large images replace this halo-duplicating stack with
        # a manual make_async_copy double-buffer from a memory_space=pl.ANY input.
        x_in = jnp.stack([xp_flat[:, :, t * L:t * L + band] for t in range(T)],
                         axis=1)                                  # (B, T, Cin, band)

    kernel = functools.partial(_fused_local_attention_kernel,
                               K=K, C=Cout, Wp=Wp, pad=padding, L=L, CL=CL)
    out_bands = pl.pallas_call(
        kernel,
        out_shape=jax.ShapeDtypeStruct((B, T, Cout, L), jnp.float32),
        grid=(B, T),
        in_specs=[
            pl.BlockSpec((CT, Cin), lambda b, t: (0, 0)),                 # weights
            pl.BlockSpec((1, 1, Cin, band), lambda b, t: (b, t, 0, 0)),   # x band
        ],
        out_specs=pl.BlockSpec((1, 1, Cout, L), lambda b, t: (b, t, 0, 0)),
        scratch_shapes=[pltpu.VMEM((CT, band), jnp.float32)],
        compiler_params=pltpu.CompilerParams(
            dimension_semantics=("parallel", "parallel"),
            vmem_limit_bytes=32 * 1024 * 1024),
    )(w_cat_t, x_in)

    # (B, T, C, TH*Wp) -> NCHW.  With T == 1 (the common case) the transpose is over
    # a degenerate axis, i.e. free; only very large images pay an XLA transpose here.
    out = out_bands.reshape(B, T, Cout, TH, Wp)
    out = out.transpose(0, 2, 1, 3, 4).reshape(B, Cout, H_rows, Wp)
    return out[:, :, :H, :W]


# ----------------------------------------------------------------------------
# Pure-JAX reference (mirrors the PyTorch forward) for a numerical sanity check
# ----------------------------------------------------------------------------
def reference_forward(x_nchw, params, *, kernel_size, stride=1, padding=0,
                      groups=1, m=4):
    del groups  # only reshapes channels in the PyTorch module; math is per-channel
    wq, wk, wv = params["wq"], params["wk"], params["wv"]
    B, Cin, H, W = x_nchw.shape
    K = kernel_size
    hi = jax.lax.Precision.HIGHEST
    x = jnp.transpose(x_nchw, (0, 2, 3, 1)).astype(jnp.float32)
    xp = jnp.pad(x, ((0, 0), (padding, padding), (padding, padding), (0, 0)))
    q = jnp.einsum("bhwc,cd->bhwd", x, wq, precision=hi)
    kk = jnp.einsum("bhwc,cd->bhwd", xp, wk, precision=hi)
    vv = jnp.einsum("bhwc,mcd->mbhwd", xp, wv, precision=hi)
    k_win = jnp.stack(
        [kk[:, ka:ka + (H - 1) * stride + 1:stride,
             kb:kb + (W - 1) * stride + 1:stride, :]
         for ka in range(K) for kb in range(K)], axis=-1)              # (B,H,W,C,KK)
    v_win = jnp.stack(
        [vv[:, :, ka:ka + (H - 1) * stride + 1:stride,
             kb:kb + (W - 1) * stride + 1:stride, :]
         for ka in range(K) for kb in range(K)], axis=-1)              # (m,B,H,W,C,KK)
    emb = _softmaxed_emb(params, K, m)                                 # (m, KK)
    v_mix = jnp.einsum("mk,mbhwck->bhwck", emb, v_win, precision=hi)
    attn = jax.nn.softmax(q[..., None] * k_win, axis=-1)
    out = jnp.sum(attn * v_mix, axis=-1)
    return jnp.transpose(out, (0, 3, 1, 2))


if __name__ == "__main__":
    B, Cin, Cout, H, W = 2, 4, 8, 16, 16
    K, stride, padding, groups, m = 3, 1, 1, 1, 4

    key = jax.random.PRNGKey(0)
    kx, kp = jax.random.split(key)
    x = jax.random.normal(kx, (B, Cin, H, W), jnp.float32)
    params = init_params(kp, Cin, Cout, K, groups=groups, m=m)

    ref = reference_forward(x, params, kernel_size=K, stride=stride,
                            padding=padding, groups=groups, m=m)

    # Main path: whole image in one lane-dense band per batch element (T == 1).
    fwd = jax.jit(functools.partial(self_attention_forward, kernel_size=K,
                                    stride=stride, padding=padding,
                                    groups=groups, m=m))
    out = jax.block_until_ready(fwd(x, params))
    assert out.shape == (B, Cout, H, W), out.shape
    # Tolerance sized for f32 MXU matmul + EUP reciprocal with one Newton step
    # (expected max error ~1e-6); far tighter than the old 1e-2 which could
    # mask real bugs.
    assert jnp.allclose(out, ref, rtol=1e-3, atol=1e-4), \
        float(jnp.max(jnp.abs(out - ref)))

    # Fallback path: force a tiny VMEM budget to exercise the multi-band halo
    # tiling (T > 1) used for very large images.
    fwd_tiled = jax.jit(functools.partial(self_attention_forward, kernel_size=K,
                                          stride=stride, padding=padding,
                                          groups=groups, m=m,
                                          vmem_budget_bytes=64 * 1024))
    out_tiled = jax.block_until_ready(fwd_tiled(x, params))
    assert jnp.allclose(out_tiled, ref, rtol=1e-3, atol=1e-4), \
        float(jnp.max(jnp.abs(out_tiled - ref)))

    print("KERNEL_OK")
</pallas_src>

<mosaic_0001>
module attributes {stable_mosaic.version = 11 : i64} {
  func.func @_fused_local_attention_kernel(%arg0: i32, %arg1: i32, %arg2: memref<88x4xf32, #tpu.memory_space<vmem>>, %arg3: memref<1x1x4x342xf32, #tpu.memory_space<vmem>>, %arg4: memref<1x1x8x288xf32, #tpu.memory_space<vmem>>, %arg5: memref<88x342xf32, #tpu.memory_space<vmem>>) attributes {dimension_semantics = [#tpu.dimension_semantics<parallel>, #tpu.dimension_semantics<parallel>], iteration_bounds = array<i64: 2, 1>, scalar_prefetch = 0 : i64, scratch_operands = 1 : i64, tpu.core_type = #tpu.core_type<tc>, window_params = [{pipeline_mode = #tpu.pipeline_mode<synchronous>, transform_indices = @transform_0, window_bounds = array<i64: 88, 4>}, {transform_indices = @transform_1, window_bounds = array<i64: 1, 1, 4, 342>}, {transform_indices = @transform_2, window_bounds = array<i64: 1, 1, 8, 288>}]} {
    %c0 = arith.constant 0 : index
    %c0_0 = arith.constant 0 : index
    %0 = vector.load %arg2[%c0, %c0_0] : memref<88x4xf32, #tpu.memory_space<vmem>>, vector<88x4xf32>
    %c0_1 = arith.constant 0 : index
    %c0_2 = arith.constant 0 : index
    %c0_3 = arith.constant 0 : index
    %c0_4 = arith.constant 0 : index
    %1 = vector.load %arg3[%c0_1, %c0_2, %c0_3, %c0_4] : memref<1x1x4x342xf32, #tpu.memory_space<vmem>>, vector<1x1x4x342xf32>
    %2 = vector.shape_cast %1 : vector<1x1x4x342xf32> to vector<4x342xf32>
    %cst = arith.constant dense<0.000000e+00> : vector<88x342xf32>
    %3 = tpu.matmul %0, %2, %cst {dimension_numbers = #tpu.dot_dimension_numbers<[1], [0], [0], [1], [0, 0, 1, 1], [], []>, precision = #tpu.contract_precision<fp32>} : vector<88x4xf32>, vector<4x342xf32>, vector<88x342xf32> -> vector<88x342xf32>
    %c0_5 = arith.constant 0 : index
    %c0_6 = arith.constant 0 : index
    %4 = vector.load %arg5[%c0_5, %c0_6] : memref<88x342xf32, #tpu.memory_space<vmem>>, vector<88x342xf32>
    tpu.vector_store %arg5[%c0_5, %c0_6], %3 {strides = array<i32>} : memref<88x342xf32, #tpu.memory_space<vmem>>, vector<88x342xf32>,
    %c0_7 = arith.constant 0 : index
    %c19 = arith.constant 19 : index
    %5 = vector.load %arg5[%c0_7, %c19] : memref<88x342xf32, #tpu.memory_space<vmem>>, vector<8x288xf32>
    %c8 = arith.constant 8 : index
    %c0_8 = arith.constant 0 : index
    %6 = vector.load %arg5[%c8, %c0_8] : memref<88x342xf32, #tpu.memory_space<vmem>>, vector<8x288xf32>
    %7 = arith.mulf %5, %6 : vector<8x288xf32>
    %c8_9 = arith.constant 8 : index
    %c1 = arith.constant 1 : index
    %8 = vector.load %arg5[%c8_9, %c1] : memref<88x342xf32, #tpu.memory_space<vmem>>, vector<8x288xf32>
    %9 = arith.mulf %5, %8 : vector<8x288xf32>
    %10 = arith.maximumf %7, %9 : vector<8x288xf32>
    %c8_10 = arith.constant 8 : index
    %c2 = arith.constant 2 : index
    %11 = vector.load %arg5[%c8_10, %c2] : memref<88x342xf32, #tpu.memory_space<vmem>>, vector<8x288xf32>
    %12 = arith.mulf %5, %11 : vector<8x288xf32>
    %13 = arith.maximumf %10, %12 : vector<8x288xf32>
    %c8_11 = arith.constant 8 : index
    %c18 = arith.constant 18 : index
    %14 = vector.load %arg5[%c8_11, %c18] : memref<88x342xf32, #tpu.memory_space<vmem>>, vector<8x288xf32>
    %15 = arith.mulf %5, %14 : vector<8x288xf32>
    %16 = arith.maximumf %13, %15 : vector<8x288xf32>
    %c8_12 = arith.constant 8 : index
    %c19_13 = arith.constant 19 : index
    %17 = vector.load %arg5[%c8_12, %c19_13] : memref<88x342xf32, #tpu.memory_space<vmem>>, vector<8x288xf32>
    %18 = arith.mulf %5, %17 : vector<8x288xf32>
    %19 = arith.maximumf %16, %18 : vector<8x288xf32>
    %c8_14 = arith.constant 8 : index
    %c20 = arith.constant 20 : index
    %20 = vector.load %arg5[%c8_14, %c20] : memref<88x342xf32, #tpu.memory_space<vmem>>, vector<8x288xf32>
    %21 = arith.mulf %5, %20 : vector<8x288xf32>
    %22 = arith.maximumf %19, %21 : vector<8x288xf32>
    %c8_15 = arith.constant 8 : index
    %c36 = arith.constant 36 : index
    %23 = vector.load %arg5[%c8_15, %c36] : memref<88x342xf32, #tpu.memory_space<vmem>>, vector<8x288xf32>
    %24 = arith.mulf %5, %23 : vector<8x288xf32>
    %25 = arith.maximumf %22, %24 : vector<8x288xf32>
    %c8_16 = arith.constant 8 : index
    %c37 = arith.constant 37 : index
    %26 = vector.load %arg5[%c8_16, %c37] : memref<88x342xf32, #tpu.memory_space<vmem>>, vector<8x288xf32>
    %27 = arith.mulf %5, %26 : vector<8x288xf32>
    %28 = arith.maximumf %25, %27 : vector<8x288xf32>
    %c8_17 = arith.constant 8 : index
    %c38 = arith.constant 38 : index
    %29 = vector.load %arg5[%c8_17, %c38] : memref<88x342xf32, #tpu.memory_space<vmem>>, vector<8x288xf32>
    %30 = arith.mulf %5, %29 : vector<8x288xf32>
    %31 = arith.maximumf %28, %30 : vector<8x288xf32>
    %c8_18 = arith.constant 8 : index
    %c0_19 = arith.constant 0 : index
    %32 = vector.load %arg5[%c8_18, %c0_19] : memref<88x342xf32, #tpu.memory_space<vmem>>, vector<8x288xf32>
    %33 = arith.mulf %5, %32 : vector<8x288xf32>
    %34 = arith.subf %33, %31 : vector<8x288xf32>
    %35 = math.exp %34 : vector<8x288xf32>
    %c16 = arith.constant 16 : index
    %c0_20 = arith.constant 0 : index
    %36 = vector.load %arg5[%c16, %c0_20] : memref<88x342xf32, #tpu.memory_space<vmem>>, vector<8x288xf32>
    %37 = arith.mulf %35, %36 : vector<8x288xf32>
    %c8_21 = arith.constant 8 : index
    %c1_22 = arith.constant 1 : index
    %38 = vector.load %arg5[%c8_21, %c1_22] : memref<88x342xf32, #tpu.memory_space<vmem>>, vector<8x288xf32>
    %39 = arith.mulf %5, %38 : vector<8x288xf32>
    %40 = arith.subf %39, %31 : vector<8x288xf32>
    %41 = math.exp %40 : vector<8x288xf32>
    %c24 = arith.constant 24 : index
    %c1_23 = arith.constant 1 : index
    %42 = vector.load %arg5[%c24, %c1_23] : memref<88x342xf32, #tpu.memory_space<vmem>>, vector<8x288xf32>
    %43 = arith.addf %35, %41 : vector<8x288xf32>
    %44 = arith.mulf %41, %42 : vector<8x288xf32>
    %45 = arith.addf %37, %44 : vector<8x288xf32>
    %c8_24 = arith.constant 8 : index
    %c2_25 = arith.constant 2 : index
    %46 = vector.load %arg5[%c8_24, %c2_25] : memref<88x342xf32, #tpu.memory_space<vmem>>, vector<8x288xf32>
    %47 = arith.mulf %5, %46 : vector<8x288xf32>
    %48 = arith.subf %47, %31 : vector<8x288xf32>
    %49 = math.exp %48 : vector<8x288xf32>
    %c32 = arith.constant 32 : index
    %c2_26 = arith.constant 2 : index
    %50 = vector.load %arg5[%c32, %c2_26] : memref<88x342xf32, #tpu.memory_space<vmem>>, vector<8x288xf32>
    %51 = arith.addf %43, %49 : vector<8x288xf32>
    %52 = arith.mulf %49, %50 : vector<8x288xf32>
    %53 = arith.addf %45, %52 : vector<8x288xf32>
    %c8_27 = arith.constant 8 : index
    %c18_28 = arith.constant 18 : index
    %54 = vector.load %arg5[%c8_27, %c18_28] : memref<88x342xf32, #tpu.memory_space<vmem>>, vector<8x288xf32>
    %55 = arith.mulf %5, %54 : vector<8x288xf32>
    %56 = arith.subf %55, %31 : vector<8x288xf32>
    %57 = math.exp %56 : vector<8x288xf32>
    %c40 = arith.constant 40 : index
    %c18_29 = arith.constant 18 : index
    %58 = vector.load %arg5[%c40, %c18_29] : memref<88x342xf32, #tpu.memory_space<vmem>>, vector<8x288xf32>
    %59 = arith.addf %51, %57 : vector<8x288xf32>
    %60 = arith.mulf %57, %58 : vector<8x288xf32>
    %61 = arith.addf %53, %60 : vector<8x288xf32>
    %c8_30 = arith.constant 8 : index
    %c19_31 = arith.constant 19 : index
    %62 = vector.load %arg5[%c8_30, %c19_31] : memref<88x342xf32, #tpu.memory_space<vmem>>, vector<8x288xf32>
    %63 = arith.mulf %5, %62 : vector<8x288xf32>
    %64 = arith.subf %63, %31 : vector<8x288xf32>
    %65 = math.exp %64 : vector<8x288xf32>
    %c48 = arith.constant 48 : index
    %c19_32 = arith.constant 19 : index
    %66 = vector.load %arg5[%c48, %c19_32] : memref<88x342xf32, #tpu.memory_space<vmem>>, vector<8x288xf32>
    %67 = arith.addf %59, %65 : vector<8x288xf32>
    %68 = arith.mulf %65, %66 : vector<8x288xf32>
    %69 = arith.addf %61, %68 : vector<8x288xf32>
    %c8_33 = arith.constant 8 : index
    %c20_34 = arith.constant 20 : index
    %70 = vector.load %arg5[%c8_33, %c20_34] : memref<88x342xf32, #tpu.memory_space<vmem>>, vector<8x288xf32>
    %71 = arith.mulf %5, %70 : vector<8x288xf32>
    %72 = arith.subf %71, %31 : vector<8x288xf32>
    %73 = math.exp %72 : vector<8x288xf32>
    %c56 = arith.constant 56 : index
    %c20_35 = arith.constant 20 : index
    %74 = vector.load %arg5[%c56, %c20_35] : memref<88x342xf32, #tpu.memory_space<vmem>>, vector<8x288xf32>
    %75 = arith.addf %67, %73 : vector<8x288xf32>
    %76 = arith.mulf %73, %74 : vector<8x288xf32>
    %77 = arith.addf %69, %76 : vector<8x288xf32>
    %c8_36 = arith.constant 8 : index
    %c36_37 = arith.constant 36 : index
    %78 = vector.load %arg5[%c8_36, %c36_37] : memref<88x342xf32, #tpu.memory_space<vmem>>, vector<8x288xf32>
    %79 = arith.mulf %5, %78 : vector<8x288xf32>
    %80 = arith.subf %79, %31 : vector<8x288xf32>
    %81 = math.exp %80 : vector<8x288xf32>
    %c64 = arith.constant 64 : index
    %c36_38 = arith.constant 36 : index
    %82 = vector.load %arg5[%c64, %c36_38] : memref<88x342xf32, #tpu.memory_space<vmem>>, vector<8x288xf32>
    %83 = arith.addf %75, %81 : vector<8x288xf32>
    %84 = arith.mulf %81, %82 : vector<8x288xf32>
    %85 = arith.addf %77, %84 : vector<8x288xf32>
    %c8_39 = arith.constant 8 : index
    %c37_40 = arith.constant 37 : index
    %86 = vector.load %arg5[%c8_39, %c37_40] : memref<88x342xf32, #tpu.memory_space<vmem>>, vector<8x288xf32>
    %87 = arith.mulf %5, %86 : vector<8x288xf32>
    %88 = arith.subf %87, %31 : vector<8x288xf32>
    %89 = math.exp %88 : vector<8x288xf32>
    %c72 = arith.constant 72 : index
    %c37_41 = arith.constant 37 : index
    %90 = vector.load %arg5[%c72, %c37_41] : memref<88x342xf32, #tpu.memory_space<vmem>>, vector<8x288xf32>
    %91 = arith.addf %83, %89 : vector<8x288xf32>
    %92 = arith.mulf %89, %90 : vector<8x288xf32>
    %93 = arith.addf %85, %92 : vector<8x288xf32>
    %c8_42 = arith.constant 8 : index
    %c38_43 = arith.constant 38 : index
    %94 = vector.load %arg5[%c8_42, %c38_43] : memref<88x342xf32, #tpu.memory_space<vmem>>, vector<8x288xf32>
    %95 = arith.mulf %5, %94 : vector<8x288xf32>
    %96 = arith.subf %95, %31 : vector<8x288xf32>
    %97 = math.exp %96 : vector<8x288xf32>
    %c80 = arith.constant 80 : index
    %c38_44 = arith.constant 38 : index
    %98 = vector.load %arg5[%c80, %c38_44] : memref<88x342xf32, #tpu.memory_space<vmem>>, vector<8x288xf32>
    %99 = arith.addf %91, %97 : vector<8x288xf32>
    %100 = arith.mulf %97, %98 : vector<8x288xf32>
    %101 = arith.addf %93, %100 : vector<8x288xf32>
    %102 = tpu.reciprocal %99 {approx = true} : vector<8x288xf32> -> vector<8x288xf32>
    %103 = arith.mulf %99, %102 : vector<8x288xf32>
    %cst_45 = arith.constant 2.000000e+00 : f32
    %104 = vector.broadcast %cst_45 : f32 to vector<8x288xf32>
    %105 = arith.subf %104, %103 : vector<8x288xf32>
    %106 = arith.mulf %102, %105 : vector<8x288xf32>
    %107 = arith.mulf %101, %106 : vector<8x288xf32>
    %c0_46 = arith.constant 0 : index
    %c0_47 = arith.constant 0 : index
    %c0_48 = arith.constant 0 : index
    %c0_49 = arith.constant 0 : index
    %108 = vector.load %arg4[%c0_46, %c0_47, %c0_48, %c0_49] : memref<1x1x8x288xf32, #tpu.memory_space<vmem>>, vector<1x1x8x288xf32>
    %109 = vector.shape_cast %108 : vector<1x1x8x288xf32> to vector<8x288xf32>
    %110 = vector.shape_cast %107 : vector<8x288xf32> to vector<1x1x8x288xf32>
    tpu.vector_store %arg4[%c0_46, %c0_47, %c0_48, %c0_49], %110 {strides = array<i32>} : memref<1x1x8x288xf32, #tpu.memory_space<vmem>>, vector<1x1x8x288xf32>,
    return
  }
  func.func @transform_0(%arg0: i32, %arg1: i32) -> (i32, i32) {
    %c0_i32 = arith.constant 0 : i32
    %c0_i32_0 = arith.constant 0 : i32
    %c0_i32_1 = arith.constant 0 : i32
    return %c0_i32, %c0_i32_0 : i32, i32
  }
  func.func @transform_1(%arg0: i32, %arg1: i32) -> (i32, i32, i32, i32) {
    %c0_i32 = arith.constant 0 : i32
    %c0_i32_0 = arith.constant 0 : i32
    %c0_i32_1 = arith.constant 0 : i32
    return %arg0, %arg1, %c0_i32, %c0_i32_0 : i32, i32, i32, i32
  }
  func.func @transform_2(%arg0: i32, %arg1: i32) -> (i32, i32, i32, i32) {
    %c0_i32 = arith.constant 0 : i32
    %c0_i32_0 = arith.constant 0 : i32
    %c0_i32_1 = arith.constant 0 : i32
    return %arg0, %arg1, %c0_i32, %c0_i32_0 : i32, i32, i32, i32
  }
}

</mosaic_0001>

<bundles_post_ra>
// kernel: self_attention_forward.1
= control target key start
LH: loop header
LB: loop body
LE: loop exit
PB: predicated region body
PF: predicated region fallthrough
CT: control target
= control target key end

     0   :  { %s3117_s9 = smov 0   ;;  %s3119_s10 = smov 0   ;;  %s4434_s0 = inlined_call_operand.vmem [shape: f32[88,4], index: 0, kind: input, shape index: {}]   ;;  %s4435_s1 = inlined_call_operand.vmem [shape: f32[2,1,4,342], index: 1, kind: input, shape index: {}]   ;;  %s4436_s2 = inlined_call_operand.vmem [shape: f32[2,1,8,288], index: 2, kind: output, shape index: {}]  }
   0x1   :  { %s3121_s11 = smov 0  }
   0x2 LB: > { %s24_s12 = sadd.s32 1, %s3086_s10  ;;  %p2682_p0 = scmp.ge.s32.totalorder %s3090_s11, 1  ;;  %s3090_s11 = sphi %s3121_s11, %s12_s11   ;;  %s3086_s10 = sphi %s3119_s10, %s4480_s10   ;;  %s3082_s9 = sphi %s3117_s9, %s4479_s9  }
   0x3   : > { %p26_p1 = scmp.ge.s32.totalorder %s24_s12, 2  ;;  %p132_p2 = scmp.lt.s32.totalorder %s3090_s11, 3 }
   0x5   : > { %s4482_s12 = smov (%p26_p1, %s24_s12), 0  ;;  %p133_p3 = pnand %p2682_p0, %p132_p2 }
   0x7   : > { %136 = sbr.rel (%p133_p3) target bundleno = 785 (0x311), region = 28 }
   0xc   : > { %p162_p4 = scmp.lt.s32.totalorder %s3082_s9, 1  ;;  %v180_v0 = vld [vmem:[%s4434_s0] sm:$0xff]  ;;  %vm196_vm0 = vcmask 31744   ;;  %v181_v1 = vld [vmem:[%s4434_s0 + $0x8] sm:$0xff]  ;;  %v3092_v2 = vmov 0.0   ;;  %v182_v5 = vld [vmem:[%s4434_s0 + $0x10] sm:$0xff] }
   0xd   : > { %303 = vmatprep.mubr.f32.mxu0 %v3092_v2  ;;  %v198_v3 = vsel %vm196_vm0, %v180_v0, 0  ;;  %v201_v4 = vsel %vm196_vm0, %v181_v1, 0  ;;  %499 = vmatprep.mubr.f32.mxu1 %v3092_v2  ;;  %v183_v6 = vld [vmem:[%s4434_s0 + $0x18] sm:$0xff]  ;;  %v204_v9 = vsel %vm196_vm0, %v182_v5, 0  ;;  %v184_v14 = vld [vmem:[%s4434_s0 + $0x20] sm:$0xff]  ;;  %vm230_vm1 = vcmask 1043456  }
   0xe   : > { %s4484_s9 = smov (!%p162_p4, %s3082_s9), 1  ;;  %v3153_v7 = vand.u32 4294901760, %v198_v3  ;;  %v3155_v8 = vand.u32 4294901760, %v201_v4  ;;  %v3158_v10 = vand.u32 4294901760, %v204_v9  ;;  %v207_v11 = vsel %vm196_vm0, %v183_v6, 0  ;;  %v185_v18 = vld [vmem:[%s4434_s0 + $0x28] sm:$0xff] }
   0xf   : > { %s2969_s21 = smul.u32 12, %s4484_s9  ;;  %v3180_v17 = vand.u32 4294901760, %v207_v11  ;;  %v210_v21 = vsel %vm196_vm0, %v184_v14, 0  ;;  %v213_v26 = vsel %vm196_vm0, %v185_v18, 0  ;;  %v186_v35 = vld [vmem:[%s4434_s0 + $0x30] sm:$0xff]  ;;  %v187_v47 = vld [vmem:[%s4434_s0 + $0x38] sm:$0xff] }
  0x10   : > { %v3163_v12 = vsub.f32 %v198_v3, %v3153_v7  ;;  %v3166_v13 = vsub.f32 %v201_v4, %v3155_v8  ;;  %v3178_v16 = vsub.f32 %v204_v9, %v3158_v10  ;;  %v3202_v30 = vand.u32 4294901760, %v210_v21  ;;  %v188_v58 = vld [vmem:[%s4434_s0 + $0x40] sm:$0xff]  ;;  %v189_v1 = vld [vmem:[%s4434_s0 + $0x48] sm:$0xff]  ;;  %v190_v14 = vld [vmem:[%s4434_s0 + $0x50] sm:$0xff]  ;;  %s3094_s15 = smov 18   ;;  %s3095_s16 = smov 19  }
  0x11   : > { %s170_s26 = scalar_lea.vmem %s4435_s1, %s2969_s21  ;;  %v3200_v29 = vsub.f32 %v207_v11, %v3180_v17  ;;  %v3222_v41 = vand.u32 4294901760, %v213_v26  ;;  %v216_v42 = vsel %vm196_vm0, %v186_v35, 0  ;;  %v219_v53 = vsel %vm196_vm0, %v187_v47, 0  ;;  %s3096_s17 = smov 1  }
  0x12   : > { %v3175_v15 = vand.u32 4294901760, %v3163_v12  ;;  %v191_v19 = vld [vmem:[%s170_s26] sm:$0xff]  ;;  %v3186_v20 = vand.u32 4294901760, %v3166_v13  ;;  %v3197_v28 = vand.u32 4294901760, %v3178_v16  ;;  %v192_v38 = vld [vmem:[%s170_s26 + $0x8] sm:$0xf]  ;;  %v3220_v40 = vsub.f32 %v210_v21, %v3202_v30 }
  0x13   : > { %v195_v22 = vcombine.high %v191_v19, %v191_v19  ;;  %v231_v23 = vsel %vm230_vm1, %v191_v19, 0  ;;  %v3217_v39 = vand.u32 4294901760, %v3200_v29  ;;  %v3239_v48 = vsel %vm230_vm1, %v192_v38, 0  ;;  %s3097_s18 = smov 17   ;;  %s3098_s19 = smov 111  }
  0x14   : > { %v307_v24 = vsub.f32 %v3163_v12, %v3175_v15  ;;  %v3192_v25 = vand.u32 4294901760, %v231_v23  ;;  %v318_v33 = vsub.f32 %v3166_v13, %v3186_v20  ;;  %v329_v46 = vsub.f32 %v3178_v16, %v3197_v28  ;;  %s3099_s20 = smov 127   ;;  %s3100_s21 = smov 110  }
  0x15   : > { %v233_v27 = vsel %vm230_vm1, %v195_v22, 0  ;;  %v3242_v51 = vsub.f32 %v213_v26, %v3222_v41  ;;  %v3244_v52 = vand.u32 4294901760, %v216_v42  ;;  %v340_v56 = vsub.f32 %v3200_v29, %v3217_v39  ;;  %s3101_s22 = smov 109   ;;  %s2970_s23 = smul.u32 24, %s4484_s9 }
  0x16   : > { %v267_v31 = vand.u32 4294901760, %v233_v27  ;;  %v3204_v32 = vand.u32 4294901760, %v307_v24  ;;  %v3209_v34 = vsub.f32 %v231_v23, %v3192_v25  ;;  %v3226_v43 = vand.u32 4294901760, %v318_v33 }
  0x17   : > { %v3248_v55 = vand.u32 4294901760, %v329_v46  ;;  %v3253_v57 = vand.u32 4294901760, %v3220_v40  ;;  %v3259_v59 = vand.u32 4294901760, %v219_v53  ;;  %v3263_v60 = vand.u32 4294901760, %v340_v56  ;;  %s179_s26 = scalar_lea.vmem %s4436_s2, %s2970_s23 }
  0x18   : > { %268 = vmatprep.subr.mxu0 %v267_v31  ;;  %v456_v36 = vsub.f32 %v233_v27, %v267_v31  ;;  %v463_v37 = vand.u32 4294901760, %v3209_v34  ;;  %v3268_v62 = vand.u32 4294901760, %v3242_v51  ;;  %v3271_v63 = vsub.f32 %v216_v42, %v3244_v52 }
  0x19   : > { %270 = vmatpush1.msra.mxu0 %v3192_v25  ;;  %v351_v61 = vsub.f32 %v3220_v40, %v3253_v57  ;;  %v222_v0 = vsel %vm196_vm0, %v188_v58, 0  ;;  %v3281_v3 = vsub.f32 %v219_v53, %v3259_v59  ;;  %v225_v11 = vsel %vm196_vm0, %v189_v1, 0 }
  0x1a   : > { %309 = vmatmul.mubr.f32.vlgmr.msra.gmra.mxu0 %v3204_v32  ;;  %v457_v44 = vand.u32 4294901760, %v456_v36  ;;  %609 = vmatprep.subr.mxu0 %v456_v36  ;;  %v464_v45 = vsub.f32 %v3209_v34, %v463_v37  ;;  %v362_v5 = vsub.f32 %v3242_v51, %v3268_v62  ;;  %v3290_v6 = vand.u32 4294901760, %v3271_v63 }
  0x1b   : > { %314 = vmatprep.mubr.f32.mxu0 %v3092_v2  ;;  %612 = vmatpush1.msra.mxu0 %v3209_v34  ;;  %v3285_v4 = vand.u32 4294901760, %v351_v61  ;;  %v3292_v9 = vand.u32 4294901760, %v222_v0  ;;  %v3301_v18 = vand.u32 4294901760, %v3281_v3  ;;  %v3312_v23 = vand.u32 4294901760, %v225_v11 }
  0x1c   : > { %v458_v49 = vsub.f32 %v456_v36, %v457_v44  ;;  %933 = vmatprep.subr.mxu0 %v457_v44  ;;  %v465_v50 = vand.u32 4294901760, %v464_v45  ;;  %v3305_v19 = vand.u32 4294901760, %v362_v5  ;;  %v373_v21 = vsub.f32 %v3271_v63, %v3290_v6 }
  0x1d   : > { %v3310_v22 = vsub.f32 %v222_v0, %v3292_v9  ;;  %v228_v24 = vsel %vm196_vm0, %v190_v14, 0  ;;  %v384_v26 = vsub.f32 %v3281_v3, %v3301_v18  ;;  %v3327_v33 = vsub.f32 %v225_v11, %v3312_v23 }
  0x1e   : > { %320 = vmatmul.mubr.f32.gmra.mxu0 %v3226_v43  ;;  %v459_v54 = vand.u32 4294901760, %v458_v49  ;;  %v3321_v27 = vand.u32 4294901760, %v373_v21  ;;  %v3329_v35 = vand.u32 4294901760, %v228_v24  ;;  %vm3093_vm2 = vmmov 0  }
  0x1f   : > { %325 = vmatprep.mubr.f32.mxu0 %v3092_v2  ;;  %v3335_v36 = vand.u32 4294901760, %v384_v26  ;;  %v3340_v42 = vand.u32 4294901760, %v3327_v33  ;;  %vm2070_vm3 = vcmask 703488   ;;  %vm2132_vm4 = vcmask 146432  }
  0x20   : > { %460 = vmatprep.subr.mxu1 %v459_v54  ;;  %v3343_v44 = vsub.f32 %v228_v24, %v3329_v35  ;;  %vm2117_vm5 = vcmask 154624   ;;  %vm2192_vm6 = vcmask 1039360   ;;  %vm2210_vm7 = vcmask 908288  }
  0x21   : > { %466 = vmatpush1.msra.mxu1 %v465_v50  ;;  %v406_v46 = vsub.f32 %v3327_v33, %v3340_v42  ;;  %vm2150_vm8 = vcmask 138240   ;;  %vm2168_vm9 = vcmask 7168   ;;  %vm2228_vm10 = vcmask 900096  }
  0x22   : > { %331 = vmatmul.mubr.f32.gmra.mxu0 %v3248_v55  ;;  %501 = vmatmul.mubr.f32.vlgmr.msra.gmra.mxu1 %v3153_v7  ;;  %v3354_v47 = vand.u32 4294901760, %v3343_v44  ;;  %vm2246_vm11 = vcmask 891904   ;;  %vm2584_vm12 = vcmask 261120  }
  0x23   : > { %765 = vmatprep.subr.mxu1 %v267_v31  ;;  %336 = vmatprep.mubr.f32.mxu0 %v3092_v2  ;;  %v3360_v49 = vand.u32 4294901760, %v406_v46 }
  0x24   : > { %767 = vmatpush1.msra.mxu1 %v3192_v25  ;;  %506 = vmatprep.mubr.f32.mxu1 %v3092_v2  ;;  %v417_v50 = vsub.f32 %v3343_v44, %v3354_v47 }
  0x25   : > { %1079 = vmatprep.subr.mxu1 %v267_v31  ;;  %v3324_v31 = vand.u32 4294901760, %v3310_v22 }
  0x26   : > { %342 = vmatmul.mubr.f32.gmra.mxu0 %v3263_v60  ;;  %508 = vmatmul.mubr.f32.gmra.mxu1 %v3155_v8  ;;  %v3368_v53 = vand.u32 4294901760, %v417_v50 }
  0x27   : > { %347 = vmatprep.mubr.f32.mxu0 %v3092_v2  ;;  %513 = vmatprep.mubr.f32.mxu1 %v3092_v2  ;;  %v395_v38 = vsub.f32 %v3310_v22, %v3324_v31 }
  0x29   : > { %v3349_v45 = vand.u32 4294901760, %v395_v38 }
  0x2a   : > { %353 = vmatmul.mubr.f32.gmra.mxu0 %v3285_v4  ;;  %515 = vmatmul.mubr.f32.gmra.mxu1 %v3158_v10 }
  0x2b   : > { %358 = vmatprep.mubr.f32.mxu0 %v3092_v2  ;;  %520 = vmatprep.mubr.f32.mxu1 %v3092_v2 }
  0x2e   : > { %364 = vmatmul.mubr.f32.gmra.mxu0 %v3305_v19  ;;  %522 = vmatmul.mubr.f32.gmra.mxu1 %v3180_v17 }
  0x2f   : > { %369 = vmatprep.mubr.f32.mxu0 %v3092_v2  ;;  %527 = vmatprep.mubr.f32.mxu1 %v3092_v2 }
  0x32   : > { %375 = vmatmul.mubr.f32.gmra.mxu0 %v3321_v27  ;;  %529 = vmatmul.mubr.f32.gmra.mxu1 %v3202_v30 }
  0x33   : > { %380 = vmatprep.mubr.f32.mxu0 %v3092_v2  ;;  %534 = vmatprep.mubr.f32.mxu1 %v3092_v2 }
  0x36   : > { %386 = vmatmul.mubr.f32.gmra.mxu0 %v3335_v36  ;;  %536 = vmatmul.mubr.f32.gmra.mxu1 %v3222_v41 }
  0x37   : > { %391 = vmatprep.mubr.f32.mxu0 %v3092_v2  ;;  %541 = vmatprep.mubr.f32.mxu1 %v3092_v2 }
  0x3a   : > { %397 = vmatmul.mubr.f32.gmra.mxu0 %v3349_v45  ;;  %543 = vmatmul.mubr.f32.gmra.mxu1 %v3244_v52 }
  0x3b   : > { %402 = vmatprep.mubr.f32.mxu0 %v3092_v2  ;;  %548 = vmatprep.mubr.f32.mxu1 %v3092_v2 }
  0x3e   : > { %408 = vmatmul.mubr.f32.gmra.mxu0 %v3360_v49  ;;  %550 = vmatmul.mubr.f32.gmra.mxu1 %v3259_v59 }
  0x3f   : > { %413 = vmatprep.mubr.f32.mxu0 %v3092_v2  ;;  %555 = vmatprep.mubr.f32.mxu1 %v3092_v2 }
  0x42   : > { %419 = vmatmul.mubr.f32.gmra.mxu0 %v3368_v53  ;;  %557 = vmatmul.mubr.f32.gmra.mxu1 %v3292_v9 }
  0x43   : > { %562 = vmatprep.mubr.f32.mxu1 %v3092_v2  ;;  %645 = vmatprep.mubr.f32.mxu0 %v3092_v2 }
  0x46   : > { %564 = vmatmul.mubr.f32.gmra.mxu1 %v3312_v23  ;;  %648 = vmatmul.mubr.f32.vlgmr.msra.gmra.mxu0 %v3163_v12 }
  0x47   : > { %569 = vmatprep.mubr.f32.mxu1 %v3092_v2  ;;  %653 = vmatprep.mubr.f32.mxu0 %v3092_v2 }
  0x48   : > { %937 = vmatpush1.msra.mxu0 %v463_v37 }
  0x49   : > { %2759 = vmatprep.subr.mxu0 %v3092_v2 }
  0x4a   : > { %571 = vmatmul.mubr.f32.gmra.mxu1 %v3329_v35  ;;  %656 = vmatmul.mubr.f32.gmra.mxu0 %v3166_v13 }
  0x4b   : > { %661 = vmatprep.mubr.f32.mxu0 %v3092_v2  ;;  %800 = vmatprep.mubr.f32.mxu1 %v3092_v2 }
  0x4e   : > { %664 = vmatmul.mubr.f32.gmra.mxu0 %v3178_v16  ;;  %804 = vmatmul.mubr.f32.vlgmr.msra.gmra.mxu1 %v3175_v15 }
  0x4f   : > { %1081 = vmatpush1.msra.mxu1 %v3192_v25  ;;  %669 = vmatprep.mubr.f32.mxu0 %v3092_v2  ;;  %v3418_v25 = vand.u32 4294901760, %v3239_v48 }
  0x50   : > { %809 = vmatprep.mubr.f32.mxu1 %v3092_v2  ;;  %2794 = vmatprep.subr.mxu1 %v3092_v2 }
  0x51   : > { %v3426_v34 = vsub.f32 %v3239_v48, %v3418_v25 }
  0x52   : > { %672 = vmatmul.mubr.f32.gmra.mxu0 %v3200_v29  ;;  %813 = vmatmul.mubr.f32.gmra.mxu1 %v3186_v20 }
  0x53   : > { %677 = vmatprep.mubr.f32.mxu0 %v3092_v2  ;;  %818 = vmatprep.mubr.f32.mxu1 %v3092_v2  ;;  %v1401_v37 = vand.u32 4294901760, %v3426_v34 }
  0x55   : > { %v1402_v48 = vsub.f32 %v3426_v34, %v1401_v37 }
  0x56   : > { %680 = vmatmul.mubr.f32.gmra.mxu0 %v3220_v40  ;;  %822 = vmatmul.mubr.f32.gmra.mxu1 %v3197_v28 }
  0x57   : > { %685 = vmatprep.mubr.f32.mxu0 %v3092_v2  ;;  %827 = vmatprep.mubr.f32.mxu1 %v3092_v2  ;;  %v1403_v54 = vand.u32 4294901760, %v1402_v48 }
  0x5a   : > { %688 = vmatmul.mubr.f32.gmra.mxu0 %v3242_v51  ;;  %831 = vmatmul.mubr.f32.gmra.mxu1 %v3217_v39 }
  0x5b   : > { %693 = vmatprep.mubr.f32.mxu0 %v3092_v2  ;;  %836 = vmatprep.mubr.f32.mxu1 %v3092_v2 }
  0x5e   : > { %696 = vmatmul.mubr.f32.gmra.mxu0 %v3271_v63  ;;  %840 = vmatmul.mubr.f32.gmra.mxu1 %v3253_v57 }
  0x5f   : > { %701 = vmatprep.mubr.f32.mxu0 %v3092_v2  ;;  %845 = vmatprep.mubr.f32.mxu1 %v3092_v2 }
  0x62   : > { %704 = vmatmul.mubr.f32.gmra.mxu0 %v3281_v3  ;;  %849 = vmatmul.mubr.f32.gmra.mxu1 %v3268_v62 }
  0x63   : > { %709 = vmatprep.mubr.f32.mxu0 %v3092_v2  ;;  %854 = vmatprep.mubr.f32.mxu1 %v3092_v2 }
  0x66   : > { %712 = vmatmul.mubr.f32.gmra.mxu0 %v3310_v22  ;;  %858 = vmatmul.mubr.f32.gmra.mxu1 %v3290_v6 }
  0x67   : > { %717 = vmatprep.mubr.f32.mxu0 %v3092_v2  ;;  %863 = vmatprep.mubr.f32.mxu1 %v3092_v2 }
  0x6a   : > { %720 = vmatmul.mubr.f32.gmra.mxu0 %v3327_v33  ;;  %867 = vmatmul.mubr.f32.gmra.mxu1 %v3301_v18 }
  0x6b   : > { %725 = vmatprep.mubr.f32.mxu0 %v3092_v2  ;;  %872 = vmatprep.mubr.f32.mxu1 %v3092_v2 }
  0x6e   : > { %728 = vmatmul.mubr.f32.gmra.mxu0 %v3343_v44  ;;  %876 = vmatmul.mubr.f32.gmra.mxu1 %v3324_v31 }
  0x6f   : > { %881 = vmatprep.mubr.f32.mxu1 %v3092_v2  ;;  %970 = vmatprep.mubr.f32.mxu0 %v3092_v2 }
  0x72   : > { %885 = vmatmul.mubr.f32.gmra.mxu1 %v3340_v42  ;;  %972 = vmatmul.mubr.f32.vlgmr.msra.gmra.mxu0 %v3153_v7 }
  0x73   : > { %890 = vmatprep.mubr.f32.mxu1 %v3092_v2  ;;  %977 = vmatprep.mubr.f32.mxu0 %v3092_v2 }
  0x74   : > { %2760 = vmatpush3.msra.mxu0 %v3418_v25 }
  0x75   : > { %2829 = vmatprep.subr.mxu0 %v3092_v2 }
  0x76   : > { %894 = vmatmul.mubr.f32.gmra.mxu1 %v3354_v47  ;;  %979 = vmatmul.mubr.f32.gmra.mxu0 %v3155_v8 }
  0x77   : > { %984 = vmatprep.mubr.f32.mxu0 %v3092_v2  ;;  %1114 = vmatprep.mubr.f32.mxu1 %v3092_v2 }
  0x7a   : > { %986 = vmatmul.mubr.f32.gmra.mxu0 %v3158_v10  ;;  %1116 = vmatmul.mubr.f32.vlgmr.msra.gmra.mxu1 %v3153_v7 }
  0x7b   : > { %2795 = vmatpush3.msra.mxu1 %v1403_v54  ;;  %991 = vmatprep.mubr.f32.mxu0 %v3092_v2 }
  0x7c   : > { %1121 = vmatprep.mubr.f32.mxu1 %v3092_v2  ;;  %2864 = vmatprep.subr.mxu1 %v3092_v2 }
  0x7e   : > { %993 = vmatmul.mubr.f32.gmra.mxu0 %v3180_v17  ;;  %1123 = vmatmul.mubr.f32.gmra.mxu1 %v3155_v8 }
  0x7f   : > { %998 = vmatprep.mubr.f32.mxu0 %v3092_v2  ;;  %1128 = vmatprep.mubr.f32.mxu1 %v3092_v2 }
  0x82   : > { %1000 = vmatmul.mubr.f32.gmra.mxu0 %v3202_v30  ;;  %1130 = vmatmul.mubr.f32.gmra.mxu1 %v3158_v10 }
  0x83   : > { %1005 = vmatprep.mubr.f32.mxu0 %v3092_v2  ;;  %1135 = vmatprep.mubr.f32.mxu1 %v3092_v2 }
  0x86   : > { %1007 = vmatmul.mubr.f32.gmra.mxu0 %v3222_v41  ;;  %1137 = vmatmul.mubr.f32.gmra.mxu1 %v3180_v17 }
  0x87   : > { %1012 = vmatprep.mubr.f32.mxu0 %v3092_v2  ;;  %1142 = vmatprep.mubr.f32.mxu1 %v3092_v2 }
  0x8a   : > { %1014 = vmatmul.mubr.f32.gmra.mxu0 %v3244_v52  ;;  %1144 = vmatmul.mubr.f32.gmra.mxu1 %v3202_v30 }
  0x8b   : > { %1019 = vmatprep.mubr.f32.mxu0 %v3092_v2  ;;  %1149 = vmatprep.mubr.f32.mxu1 %v3092_v2 }
  0x8e   : > { %1021 = vmatmul.mubr.f32.gmra.mxu0 %v3259_v59  ;;  %1151 = vmatmul.mubr.f32.gmra.mxu1 %v3222_v41 }
  0x8f   : > { %1026 = vmatprep.mubr.f32.mxu0 %v3092_v2  ;;  %1156 = vmatprep.mubr.f32.mxu1 %v3092_v2 }
  0x92   : > { %1028 = vmatmul.mubr.f32.gmra.mxu0 %v3292_v9  ;;  %1158 = vmatmul.mubr.f32.gmra.mxu1 %v3244_v52 }
  0x93   : > { %1033 = vmatprep.mubr.f32.mxu0 %v3092_v2  ;;  %1163 = vmatprep.mubr.f32.mxu1 %v3092_v2 }
  0x96   : > { %1035 = vmatmul.mubr.f32.gmra.mxu0 %v3312_v23  ;;  %1165 = vmatmul.mubr.f32.gmra.mxu1 %v3259_v59 }
  0x97   : > { %1040 = vmatprep.mubr.f32.mxu0 %v3092_v2  ;;  %1170 = vmatprep.mubr.f32.mxu1 %v3092_v2 }
  0x9a   : > { %1042 = vmatmul.mubr.f32.gmra.mxu0 %v3329_v35  ;;  %1172 = vmatmul.mubr.f32.gmra.mxu1 %v3292_v9 }
  0x9b   : > { %1177 = vmatprep.mubr.f32.mxu1 %v3092_v2  ;;  %2761 = vmatprep.mubr.msk.f32.mxu0 %vm3093_vm2, %v3092_v2 }
  0x9e   : > { %1179 = vmatmul.mubr.f32.gmra.mxu1 %v3312_v23  ;;  %2762 = vmatmul.mubr.f32.vlgmr.msra.gmra.mxu0 %v3204_v32 }
  0x9f   : > { %1184 = vmatprep.mubr.f32.mxu1 %v3092_v2  ;;  %2764 = vmatprep.mubr.msk.f32.mxu0 %vm3093_vm2, %v3092_v2 }
  0xa0   : > { %2830 = vmatpush3.msra.mxu0 %v3426_v34 }
  0xa1   : > { %2899 = vmatprep.subr.mxu0 %v3092_v2 }
  0xa2   : > { %1186 = vmatmul.mubr.f32.gmra.mxu1 %v3329_v35  ;;  %2765 = vmatmul.mubr.f32.gmra.mxu0 %v3226_v43 }
  0xa3   : > { %2767 = vmatprep.mubr.msk.f32.mxu0 %vm3093_vm2, %v3092_v2  ;;  %2796 = vmatprep.mubr.msk.f32.mxu1 %vm3093_vm2, %v3092_v2 }
  0xa6   : > { %2768 = vmatmul.mubr.f32.gmra.mxu0 %v3248_v55  ;;  %2797 = vmatmul.mubr.f32.vlgmr.msra.gmra.mxu1 %v3153_v7 }
  0xa7   : > { %2865 = vmatpush3.msra.mxu1 %v3418_v25  ;;  %2770 = vmatprep.mubr.msk.f32.mxu0 %vm3093_vm2, %v3092_v2 }
  0xa8   : > { %2799 = vmatprep.mubr.msk.f32.mxu1 %vm3093_vm2, %v3092_v2  ;;  %2934 = vmatprep.subr.mxu1 %v3092_v2 }
  0xaa   : > { %2771 = vmatmul.mubr.f32.gmra.mxu0 %v3263_v60  ;;  %2800 = vmatmul.mubr.f32.gmra.mxu1 %v3155_v8 }
  0xab   : > { %2773 = vmatprep.mubr.msk.f32.mxu0 %vm3093_vm2, %v3092_v2  ;;  %2802 = vmatprep.mubr.msk.f32.mxu1 %vm3093_vm2, %v3092_v2 }
  0xae   : > { %2774 = vmatmul.mubr.f32.gmra.mxu0 %v3285_v4  ;;  %2803 = vmatmul.mubr.f32.gmra.mxu1 %v3158_v10 }
  0xaf   : > { %2776 = vmatprep.mubr.msk.f32.mxu0 %vm3093_vm2, %v3092_v2  ;;  %2805 = vmatprep.mubr.msk.f32.mxu1 %vm3093_vm2, %v3092_v2 }
  0xb2   : > { %2777 = vmatmul.mubr.f32.gmra.mxu0 %v3305_v19  ;;  %2806 = vmatmul.mubr.f32.gmra.mxu1 %v3180_v17 }
  0xb3   : > { %2779 = vmatprep.mubr.msk.f32.mxu0 %vm3093_vm2, %v3092_v2  ;;  %2808 = vmatprep.mubr.msk.f32.mxu1 %vm3093_vm2, %v3092_v2 }
  0xb6   : > { %2780 = vmatmul.mubr.f32.gmra.mxu0 %v3321_v27  ;;  %2809 = vmatmul.mubr.f32.gmra.mxu1 %v3202_v30 }
  0xb7   : > { %2782 = vmatprep.mubr.msk.f32.mxu0 %vm3093_vm2, %v3092_v2  ;;  %2811 = vmatprep.mubr.msk.f32.mxu1 %vm3093_vm2, %v3092_v2 }
  0xba   : > { %2783 = vmatmul.mubr.f32.gmra.mxu0 %v3335_v36  ;;  %2812 = vmatmul.mubr.f32.gmra.mxu1 %v3222_v41 }
  0xbb   : > { %2785 = vmatprep.mubr.msk.f32.mxu0 %vm3093_vm2, %v3092_v2  ;;  %2814 = vmatprep.mubr.msk.f32.mxu1 %vm3093_vm2, %v3092_v2 }
  0xbe   : > { %2786 = vmatmul.mubr.f32.gmra.mxu0 %v3349_v45  ;;  %2815 = vmatmul.mubr.f32.gmra.mxu1 %v3244_v52 }
  0xbf   : > { %2788 = vmatprep.mubr.msk.f32.mxu0 %vm3093_vm2, %v3092_v2  ;;  %2817 = vmatprep.mubr.msk.f32.mxu1 %vm3093_vm2, %v3092_v2 }
  0xc2   : > { %2789 = vmatmul.mubr.f32.gmra.mxu0 %v3360_v49  ;;  %2818 = vmatmul.mubr.f32.gmra.mxu1 %v3259_v59 }
  0xc3   : > { %2791 = vmatprep.mubr.msk.f32.mxu0 %vm3093_vm2, %v3092_v2  ;;  %2820 = vmatprep.mubr.msk.f32.mxu1 %vm3093_vm2, %v3092_v2 }
  0xc6   : > { %2792 = vmatmul.mubr.f32.gmra.mxu0 %v3368_v53  ;;  %2821 = vmatmul.mubr.f32.gmra.mxu1 %v3292_v9 }
  0xc7   : > { %2823 = vmatprep.mubr.msk.f32.mxu1 %vm3093_vm2, %v3092_v2  ;;  %2831 = vmatprep.mubr.msk.f32.mxu0 %vm3093_vm2, %v3092_v2 }
  0xca   : > { %2824 = vmatmul.mubr.f32.gmra.mxu1 %v3312_v23  ;;  %2832 = vmatmul.mubr.f32.vlgmr.msra.gmra.mxu0 %v3163_v12 }
  0xcb   : > { %2826 = vmatprep.mubr.msk.f32.mxu1 %vm3093_vm2, %v3092_v2  ;;  %2834 = vmatprep.mubr.msk.f32.mxu0 %vm3093_vm2, %v3092_v2 }
  0xcc   : > { %2900 = vmatpush3.msra.mxu0 %v1401_v37 }
  0xce   : > { %2827 = vmatmul.mubr.f32.gmra.mxu1 %v3329_v35  ;;  %2835 = vmatmul.mubr.f32.gmra.mxu0 %v3166_v13 }
  0xcf   : > { %2837 = vmatprep.mubr.msk.f32.mxu0 %vm3093_vm2, %v3092_v2  ;;  %2866 = vmatprep.mubr.msk.f32.mxu1 %vm3093_vm2, %v3092_v2 }
  0xd2   : > { %2838 = vmatmul.mubr.f32.gmra.mxu0 %v3178_v16  ;;  %2867 = vmatmul.mubr.f32.vlgmr.msra.gmra.mxu1 %v3175_v15 }
  0xd3   : > { %2935 = vmatpush3.msra.mxu1 %v3418_v25  ;;  %2840 = vmatprep.mubr.msk.f32.mxu0 %vm3093_vm2, %v3092_v2 }
  0xd4   : > { %2869 = vmatprep.mubr.msk.f32.mxu1 %vm3093_vm2, %v3092_v2 }
  0xd6   : > { %2841 = vmatmul.mubr.f32.gmra.mxu0 %v3200_v29  ;;  %2870 = vmatmul.mubr.f32.gmra.mxu1 %v3186_v20 }
  0xd7   : > { %2843 = vmatprep.mubr.msk.f32.mxu0 %vm3093_vm2, %v3092_v2  ;;  %2872 = vmatprep.mubr.msk.f32.mxu1 %vm3093_vm2, %v3092_v2 }
  0xda   : > { %v310_v12 = vpop.f32.mrf.mxu0  ;;  %2844 = vmatmul.mubr.f32.gmra.mxu0 %v3220_v40  ;;  %2873 = vmatmul.mubr.f32.gmra.mxu1 %v3197_v28 }
  0xdb   : > { %2846 = vmatprep.mubr.msk.f32.mxu0 %vm3093_vm2, %v3092_v2  ;;  %2875 = vmatprep.mubr.msk.f32.mxu1 %vm3093_vm2, %v3092_v2 }
  0xdc   : > { %v312_v13 = vpop.f32.mrf.mxu0 }
  0xde   : > { %v321_v15 = vpop.f32.mrf.mxu0  ;;  %2847 = vmatmul.mubr.f32.gmra.mxu0 %v3242_v51  ;;  %2876 = vmatmul.mubr.f32.gmra.mxu1 %v3217_v39 }
  0xdf   : > { %2849 = vmatprep.mubr.msk.f32.mxu0 %vm3093_vm2, %v3092_v2  ;;  %2878 = vmatprep.mubr.msk.f32.mxu1 %vm3093_vm2, %v3092_v2 }
  0xe0   : > { %v323_v16 = vpop.f32.mrf.mxu0 }
  0xe2   : > { %v332_v20 = vpop.f32.mrf.mxu0  ;;  %v502_v28 = vpop.f32.mrf.mxu1  ;;  %2850 = vmatmul.mubr.f32.gmra.mxu0 %v3271_v63  ;;  %2879 = vmatmul.mubr.f32.gmra.mxu1 %v3253_v57 }
  0xe3   : > { %v3594_v29 = vadd.f32 %v502_v28, %v310_v12  ;;  %2852 = vmatprep.mubr.msk.f32.mxu0 %vm3093_vm2, %v3092_v2  ;;  %2881 = vmatprep.mubr.msk.f32.mxu1 %vm3093_vm2, %v3092_v2 }
  0xe4   : > { %v334_v32 = vpop.f32.mrf.mxu0  ;;  %v504_v39 = vpop.f32.mrf.mxu1 }
  0xe5   : > { %v3600_v40 = vadd.f32 %v504_v39, %v312_v13 }
  0xe6   : > { %v343_v43 = vpop.f32.mrf.mxu0  ;;  %v509_v51 = vpop.f32.mrf.mxu1  ;;  %2853 = vmatmul.mubr.f32.gmra.mxu0 %v3281_v3  ;;  %2882 = vmatmul.mubr.f32.gmra.mxu1 %v3268_v62 }
  0xe7   : > { %v3604_v55 = vadd.f32 %v509_v51, %v321_v15  ;;  %2855 = vmatprep.mubr.msk.f32.mxu0 %vm3093_vm2, %v3092_v2  ;;  %2884 = vmatprep.mubr.msk.f32.mxu1 %vm3093_vm2, %v3092_v2 }
  0xe8   : > { %v345_v56 = vpop.f32.mrf.mxu0  ;;  %v511_v57 = vpop.f32.mrf.mxu1 }
  0xe9   : > { %v3610_v58 = vadd.f32 %v511_v57, %v323_v16 }
  0xea   : > { %v354_v60 = vpop.f32.mrf.mxu0  ;;  %v516_v61 = vpop.f32.mrf.mxu1  ;;  %2856 = vmatmul.mubr.f32.gmra.mxu0 %v3310_v22  ;;  %2885 = vmatmul.mubr.f32.gmra.mxu1 %v3290_v6 }
  0xeb   : > { %v3614_v63 = vadd.f32 %v516_v61, %v332_v20  ;;  %2858 = vmatprep.mubr.msk.f32.mxu0 %vm3093_vm2, %v3092_v2  ;;  %2887 = vmatprep.mubr.msk.f32.mxu1 %vm3093_vm2, %v3092_v2 }
  0xec   : > { %v356_v62 = vpop.f32.mrf.mxu0  ;;  %v518_v0 = vpop.f32.mrf.mxu1 }
  0xed   : > { %v3620_v1 = vadd.f32 %v518_v0, %v334_v32 }
  0xee   : > { %v365_v3 = vpop.f32.mrf.mxu0  ;;  %v523_v4 = vpop.f32.mrf.mxu1  ;;  %2859 = vmatmul.mubr.f32.gmra.mxu0 %v3327_v33  ;;  %2888 = vmatmul.mubr.f32.gmra.mxu1 %v3301_v18 }
  0xef   : > { %v3624_v5 = vadd.f32 %v523_v4, %v343_v43  ;;  %2861 = vmatprep.mubr.msk.f32.mxu0 %vm3093_vm2, %v3092_v2  ;;  %2890 = vmatprep.mubr.msk.f32.mxu1 %vm3093_vm2, %v3092_v2 }
  0xf0   : > { %v367_v6 = vpop.f32.mrf.mxu0  ;;  %v525_v11 = vpop.f32.mrf.mxu1 }
  0xf1   : > { %v3630_v14 = vadd.f32 %v525_v11, %v345_v56 }
  0xf2   : > { %v376_v19 = vpop.f32.mrf.mxu0  ;;  %v530_v21 = vpop.f32.mrf.mxu1  ;;  %2862 = vmatmul.mubr.f32.gmra.mxu0 %v3343_v44  ;;  %2891 = vmatmul.mubr.f32.gmra.mxu1 %v3324_v31 }
  0xf3   : > { %v3634_v22 = vadd.f32 %v530_v21, %v354_v60  ;;  %2893 = vmatprep.mubr.msk.f32.mxu1 %vm3093_vm2, %v3092_v2  ;;  %2901 = vmatprep.mubr.msk.f32.mxu0 %vm3093_vm2, %v3092_v2 }
  0xf4   : > { %v378_v18 = vpop.f32.mrf.mxu0  ;;  %v532_v24 = vpop.f32.mrf.mxu1 }
  0xf5   : > { %v3640_v26 = vadd.f32 %v532_v24, %v356_v62 }
  0xf6   : > { %v387_v27 = vpop.f32.mrf.mxu0  ;;  %v537_v33 = vpop.f32.mrf.mxu1  ;;  %2894 = vmatmul.mubr.f32.gmra.mxu1 %v3340_v42  ;;  %2902 = vmatmul.mubr.f32.vlgmr.msra.gmra.mxu0 %v3153_v7 }
  0xf7   : > { %v3644_v36 = vadd.f32 %v537_v33, %v365_v3  ;;  %2896 = vmatprep.mubr.msk.f32.mxu1 %vm3093_vm2, %v3092_v2  ;;  %2904 = vmatprep.mubr.msk.f32.mxu0 %vm3093_vm2, %v3092_v2 }
  0xf8   : > { %v389_v31 = vpop.f32.mrf.mxu0  ;;  %v539_v38 = vpop.f32.mrf.mxu1 }
  0xf9   : > { %v3650_v44 = vadd.f32 %v539_v38, %v367_v6 }
  0xfa   : > { %v398_v45 = vpop.f32.mrf.mxu0  ;;  %v544_v46 = vpop.f32.mrf.mxu1  ;;  %2897 = vmatmul.mubr.f32.gmra.mxu1 %v3354_v47  ;;  %2905 = vmatmul.mubr.f32.gmra.mxu0 %v3155_v8 }
  0xfb   : > { %v3654_v42 = vadd.f32 %v544_v46, %v376_v19  ;;  %2907 = vmatprep.mubr.msk.f32.mxu0 %vm3093_vm2, %v3092_v2  ;;  %2936 = vmatprep.mubr.msk.f32.mxu1 %vm3093_vm2, %v3092_v2 }
  0xfc   : > { %v400_v49 = vpop.f32.mrf.mxu0  ;;  %v546_v50 = vpop.f32.mrf.mxu1 }
  0xfd   : > { %v3660_v53 = vadd.f32 %v546_v50, %v378_v18 }
  0xfe   : > { %v409_v25 = vpop.f32.mrf.mxu0  ;;  %v551_v34 = vpop.f32.mrf.mxu1  ;;  %2908 = vmatmul.mubr.f32.gmra.mxu0 %v3158_v10  ;;  %2937 = vmatmul.mubr.f32.vlgmr.msra.gmra.mxu1 %v3153_v7 }
  0xff   : > { %v3664_v47 = vadd.f32 %v551_v34, %v387_v27  ;;  %2910 = vmatprep.mubr.msk.f32.mxu0 %vm3093_vm2, %v3092_v2  ;;  %2939 = vmatprep.mubr.msk.f32.mxu1 %vm3093_vm2, %v3092_v2 }
 0x100   : > { %v411_v37 = vpop.f32.mrf.mxu0  ;;  %v553_v48 = vpop.f32.mrf.mxu1 }
 0x101   : > { %v3670_v54 = vadd.f32 %v553_v48, %v389_v31 }
 0x102   : > { %v420_v12 = vpop.f32.mrf.mxu0  ;;  %v558_v13 = vpop.f32.mrf.mxu1  ;;  %2911 = vmatmul.mubr.f32.gmra.mxu0 %v3180_v17  ;;  %2940 = vmatmul.mubr.f32.gmra.mxu1 %v3155_v8 }
 0x103   : > { %v3674_v15 = vadd.f32 %v558_v13, %v398_v45  ;;  %2913 = vmatprep.mubr.msk.f32.mxu0 %vm3093_vm2, %v3092_v2  ;;  %2942 = vmatprep.mubr.msk.f32.mxu1 %vm3093_vm2, %v3092_v2 }
 0x104   : > { %v422_v7 = vpop.f32.mrf.mxu0  ;;  %v560_v16 = vpop.f32.mrf.mxu1 }
 0x105   : > { %v3680_v20 = vadd.f32 %v560_v16, %v400_v49 }
 0x106   : > { %v565_v28 = vpop.f32.mrf.mxu1  ;;  %v3682_v32 = vpop.f32.mrf.mxu0  ;;  %2914 = vmatmul.mubr.f32.gmra.mxu0 %v3202_v30  ;;  %2943 = vmatmul.mubr.f32.gmra.mxu1 %v3158_v10 }
 0x107   : > { %4439 = vst [vmem:[#allocation3_spill] sm:$0xff] %v3680_v20  ;;  %v3686_v8 = vadd.f32 %v565_v28, %v409_v25  ;;  %2916 = vmatprep.mubr.msk.f32.mxu0 %vm3093_vm2, %v3092_v2  ;;  %2945 = vmatprep.mubr.msk.f32.mxu1 %vm3093_vm2, %v3092_v2 }
 0x108   : > { %v567_v39 = vpop.f32.mrf.mxu1  ;;  %v3692_v43 = vpop.f32.mrf.mxu0 }
 0x109   : > { %4440 = vst [vmem:[#allocation4_spill] sm:$0xff] %v3686_v8  ;;  %v3694_v51 = vadd.f32 %v567_v39, %v411_v37 }
 0x10a   : > { %v572_v56 = vpop.f32.mrf.mxu1  ;;  %v3696_v57 = vpop.f32.mrf.mxu0  ;;  %2917 = vmatmul.mubr.f32.gmra.mxu0 %v3222_v41  ;;  %2946 = vmatmul.mubr.f32.gmra.mxu1 %v3180_v17 }
 0x10b   : > { %4441 = vst [vmem:[#allocation5_spill] sm:$0xff] %v3694_v51  ;;  %v3700_v10 = vadd.f32 %v572_v56, %v420_v12  ;;  %2919 = vmatprep.mubr.msk.f32.mxu0 %vm3093_vm2, %v3092_v2  ;;  %2948 = vmatprep.mubr.msk.f32.mxu1 %vm3093_vm2, %v3092_v2  ;;  %v650_v51 = vadd.f32 %v3682_v32, %v3594_v29 }
 0x10c   : > { %v574_v60 = vpop.f32.mrf.mxu1  ;;  %v3706_v61 = vpop.f32.mrf.mxu0 }
 0x10d   : > { %4442 = vst [vmem:[#allocation6_spill] sm:$0xff] %v3700_v10  ;;  %v3708_v62 = vadd.f32 %v574_v60, %v422_v7  ;;  %v660_v29 = vadd.f32 %v3706_v61, %v3610_v58 }
 0x10e   : > { %v3710_v0 = vpop.f32.mrf.mxu0  ;;  %v3712_v3 = vpop.f32.mrf.mxu1  ;;  %2920 = vmatmul.mubr.f32.gmra.mxu0 %v3244_v52  ;;  %2949 = vmatmul.mubr.f32.gmra.mxu1 %v3202_v30 }
 0x10f   : > { %4443 = vst [vmem:[#allocation7_spill] sm:$0xff] %v3708_v62  ;;  %2922 = vmatprep.mubr.msk.f32.mxu0 %vm3093_vm2, %v3092_v2  ;;  %2951 = vmatprep.mubr.msk.f32.mxu1 %vm3093_vm2, %v3092_v2  ;;  %v806_v8 = vadd.f32 %v3712_v3, %v650_v51  ;;  %v666_v3 = vadd.f32 %v3710_v0, %v3614_v63 }
 0x110   : > { %v3720_v17 = vpop.f32.mrf.mxu0  ;;  %v3722_v4 = vpop.f32.mrf.mxu1 }
 0x111   : > { %v668_v58 = vadd.f32 %v3720_v17, %v3620_v1 }
 0x112   : > { %v3724_v6 = vpop.f32.mrf.mxu0  ;;  %v3726_v11 = vpop.f32.mrf.mxu1  ;;  %2923 = vmatmul.mubr.f32.gmra.mxu0 %v3259_v59  ;;  %2952 = vmatmul.mubr.f32.gmra.mxu1 %v3222_v41 }
 0x113   : > { %2925 = vmatprep.mubr.msk.f32.mxu0 %vm3093_vm2, %v3092_v2  ;;  %2954 = vmatprep.mubr.msk.f32.mxu1 %vm3093_vm2, %v3092_v2 }
 0x114   : > { %v3734_v30 = vpop.f32.mrf.mxu0  ;;  %v3736_v19 = vpop.f32.mrf.mxu1 }
 0x116   : > { %v3738_v21 = vpop.f32.mrf.mxu0  ;;  %v3740_v18 = vpop.f32.mrf.mxu1  ;;  %2926 = vmatmul.mubr.f32.gmra.mxu0 %v3292_v9  ;;  %2955 = vmatmul.mubr.f32.gmra.mxu1 %v3244_v52 }
 0x117   : > { %2928 = vmatprep.mubr.msk.f32.mxu0 %vm3093_vm2, %v3092_v2  ;;  %2957 = vmatprep.mubr.msk.f32.mxu1 %vm3093_vm2, %v3092_v2  ;;  %v824_v61 = vadd.f32 %v3740_v18, %v666_v3 }
 0x118   : > { %v3748_v41 = vpop.f32.mrf.mxu0  ;;  %v3750_v24 = vpop.f32.mrf.mxu1 }
 0x119   : > { %v826_v0 = vadd.f32 %v3750_v24, %v668_v58 }
 0x11a   : > { %v3752_v27 = vpop.f32.mrf.mxu0  ;;  %v3754_v33 = vpop.f32.mrf.mxu1  ;;  %2929 = vmatmul.mubr.f32.gmra.mxu0 %v3312_v23  ;;  %2958 = vmatmul.mubr.f32.gmra.mxu1 %v3259_v59 }
 0x11b   : > { %2931 = vmatprep.mubr.msk.f32.mxu0 %vm3093_vm2, %v3092_v2  ;;  %2960 = vmatprep.mubr.msk.f32.mxu1 %vm3093_vm2, %v3092_v2 }
 0x11c   : > { %v3762_v52 = vpop.f32.mrf.mxu0  ;;  %v3764_v31 = vpop.f32.mrf.mxu1 }
 0x11e   : > { %v3766_v38 = vpop.f32.mrf.mxu0  ;;  %v3768_v45 = vpop.f32.mrf.mxu1  ;;  %2932 = vmatmul.mubr.f32.gmra.mxu0 %v3329_v35  ;;  %2961 = vmatmul.mubr.f32.gmra.mxu1 %v3292_v9 }
 0x11f   : > { %2963 = vmatprep.mubr.msk.f32.mxu1 %vm3093_vm2, %v3092_v2 }
 0x120   : > { %v3774_v59 = vpop.f32.mrf.mxu0  ;;  %v3776_v46 = vpop.f32.mrf.mxu1 }
 0x122   : > { %v3778_v49 = vpop.f32.mrf.mxu0  ;;  %v3780_v50 = vpop.f32.mrf.mxu1  ;;  %2964 = vmatmul.mubr.f32.gmra.mxu1 %v3312_v23 }
 0x123   : > { %2966 = vmatprep.mubr.msk.f32.mxu1 %vm3093_vm2, %v3092_v2 }
 0x124   : > { %v3785_v25 = vpop.f32.mrf.mxu0  ;;  %v3787_v34 = vpop.f32.mrf.mxu1 }
 0x126   : > { %v3789_v9 = vpop.f32.mrf.mxu0  ;;  %v3791_v37 = vpop.f32.mrf.mxu1  ;;  %2967 = vmatmul.mubr.f32.gmra.mxu1 %v3329_v35 }
 0x128   : > { %v3794_v48 = vpop.f32.mrf.mxu0  ;;  %v3796_v12 = vpop.f32.mrf.mxu1 }
 0x129   : > { %4444 = vst [vmem:[#allocation8_spill] sm:$0xff] %v3794_v48 }
 0x12a   : > { %v3798_v13 = vpop.f32.mrf.mxu0  ;;  %v3800_v23 = vpop.f32.mrf.mxu1 }
 0x12b   : > { %4445 = vst [vmem:[#allocation9_spill] sm:$0xff] %v3798_v13 }
 0x12c   : > { %v3802_v7 = vpop.f32.mrf.mxu0  ;;  %v3804_v2 = vpop.f32.mrf.mxu1 }
 0x12d   : > { %4446 = vst [vmem:[#allocation10_spill] sm:$0xff] %v3802_v7 }
 0x12e   : > { %v3806_v16 = vpop.f32.mrf.mxu0  ;;  %v3808_v28 = vpop.f32.mrf.mxu1 }
 0x12f   : > { %4447 = vst [vmem:[#allocation11_spill] sm:$0xff] %v3806_v16  ;;  %4448 = vst [vmem:[#allocation12_spill] sm:$0xff] %v3808_v28  ;;  %v652_v16 = vadd.f32 %v3692_v43, %v3600_v40 }
 0x130   : > { %v3810_v39 = vpop.f32.mrf.mxu0  ;;  %v3812_v56 = vpop.f32.mrf.mxu1 }
 0x131   : > { %4449 = vst [vmem:[#allocation13_spill] sm:$0xff] %v3810_v39  ;;  %4450 = vst [vmem:[#allocation14_spill] sm:$0xff] %v3812_v56 }
 0x132   : > { %v3814_v35 = vpop.f32.mrf.mxu1  ;;  %v973_v60 = vpop.f32.mrf.mxu0 }
 0x133   : > { %4451 = vst [vmem:[#allocation15_spill] sm:$0xff] %v3814_v35  ;;  %v658_v35 = vadd.f32 %v3696_v57, %v3604_v55  ;;  %v974_v28 = vadd.f32 %v973_v60, %v806_v8  ;;  %v817_v55 = vadd.f32 %v3736_v19, %v660_v29  ;;  %v690_v29 = vadd.f32 %v3752_v27, %v3644_v36 }
 0x134   : > { %v3816_v62 = vpop.f32.mrf.mxu1  ;;  %v975_v10 = vpop.f32.mrf.mxu0  ;;  %v692_v36 = vadd.f32 %v3762_v52, %v3650_v44 }
 0x135   : > { %4452 = vst [vmem:[#allocation16_spill] sm:$0xff] %v3816_v62  ;;  %v808_v62 = vadd.f32 %v3722_v4, %v652_v16  ;;  %v815_v32 = vadd.f32 %v3726_v11, %v658_v35  ;;  %v851_v27 = vadd.f32 %v3780_v50, %v690_v29  ;;  %v700_v50 = vadd.f32 %v3774_v59, %v3660_v53 }
 0x136   : > { %v3820_v7 = vpop.f32.mrf.mxu1  ;;  %v980_v13 = vpop.f32.mrf.mxu0  ;;  %v853_v58 = vadd.f32 %v3787_v34, %v692_v36  ;;  %v706_v34 = vadd.f32 %v3778_v49, %v3664_v47  ;;  %v4463_v36 = vld [vmem:[#allocation10_spill] sm:$0xff] }
 0x137   : > { %4453 = vst [vmem:[#allocation17_spill] sm:$0xff] %v3820_v7  ;;  %v976_v7 = vadd.f32 %v975_v10, %v808_v62  ;;  %v981_v57 = vadd.f32 %v980_v13, %v815_v32  ;;  %v674_v62 = vadd.f32 %v3724_v6, %v3624_v5  ;;  %v676_v5 = vadd.f32 %v3734_v30, %v3630_v14 }
 0x138   : > { %v3825_v39 = vpop.f32.mrf.mxu1  ;;  %v982_v56 = vpop.f32.mrf.mxu0  ;;  %v869_v47 = vadd.f32 %v3800_v23, %v706_v34  ;;  %v4456_v23 = vld [vmem:[#allocation3_spill] sm:$0xff]  ;;  %v4461_v29 = vld [vmem:[#allocation14_spill] sm:$0xff] }
 0x139   : > { %v983_v10 = vadd.f32 %v982_v56, %v817_v55  ;;  %v833_v6 = vadd.f32 %v3754_v33, %v674_v62  ;;  %v835_v56 = vadd.f32 %v3764_v31, %v676_v5 }
 0x13a   : > { %v987_v48 = vpop.f32.mrf.mxu0  ;;  %v1117_v20 = vpop.f32.mrf.mxu1 }
 0x13b   : > { %v3833_v40 = vadd.f32 %v1117_v20, %v974_v28  ;;  %v988_v19 = vadd.f32 %v987_v48, %v824_v61  ;;  %v682_v48 = vadd.f32 %v3738_v21, %v3634_v22  ;;  %v684_v22 = vadd.f32 %v3748_v41, %v3640_v26 }
 0x13c   : > { %v989_v43 = vpop.f32.mrf.mxu0  ;;  %v1119_v51 = vpop.f32.mrf.mxu1 }
 0x13d   : > { %4454 = vst [vmem:[#allocation18_spill] sm:$0xff] %v3833_v40  ;;  %v3838_v4 = vadd.f32 %v1119_v51, %v976_v7  ;;  %v990_v18 = vadd.f32 %v989_v43, %v826_v0  ;;  %v842_v21 = vadd.f32 %v3768_v45, %v682_v48  ;;  %v844_v51 = vadd.f32 %v3776_v46, %v684_v22  ;;  %v4459_v22 = vld [vmem:[#allocation4_spill] sm:$0xff] }
 0x13e   : > { %v994_v8 = vpop.f32.mrf.mxu0  ;;  %v1124_v16 = vpop.f32.mrf.mxu1  ;;  %v862_v0 = vadd.f32 %v3796_v12, %v700_v50  ;;  %v714_v12 = vadd.f32 %v3789_v9, %v3674_v15 }
 0x13f   : > { %4455 = vst [vmem:[#allocation19_spill] sm:$0xff] %v3838_v4  ;;  %v3843_v20 = vadd.f32 %v1124_v16, %v981_v57  ;;  %v995_v35 = vadd.f32 %v994_v8, %v833_v6  ;;  %v698_v57 = vadd.f32 %v3766_v38, %v3654_v42 }
 0x140   : > { %v996_v11 = vpop.f32.mrf.mxu0  ;;  %v1126_v63 = vpop.f32.mrf.mxu1 }
 0x141   : > { %v3848_v13 = vadd.f32 %v1126_v63, %v983_v10  ;;  %2126 = vrot.lane.b32.xlu1 %v3843_v20, %s3094_s15  ;;  %2111 = vrot.lane.b32.xlu0 %v3843_v20, %s3095_s16  ;;  %v997_v33 = vadd.f32 %v996_v11, %v835_v56  ;;  %v860_v42 = vadd.f32 %v3791_v37, %v698_v57 }
 0x142   : > { %v1001_v1 = vpop.f32.mrf.mxu0  ;;  %v1131_v17 = vpop.f32.mrf.mxu1  ;;  %v708_v37 = vadd.f32 %v3785_v25, %v3670_v54 }
 0x143   : > { %v3857_v24 = vadd.f32 %v1131_v17, %v988_v19  ;;  %v1002_v3 = vadd.f32 %v1001_v1, %v842_v21  ;;  %v4460_v21 = vld [vmem:[#allocation9_spill] sm:$0xff] }
 0x144   : > { %v1003_v7 = vpop.f32.mrf.mxu0  ;;  %v1133_v28 = vpop.f32.mrf.mxu1 }
 0x145   : > { %v3862_v60 = vadd.f32 %v1133_v28, %v990_v18  ;;  %2162 = vrot.lane.b32.xlu1 %v3843_v20, %s3096_s17  ;;  %2144 = vrot.lane.b32.xlu0 %v3843_v20, %s3097_s18  ;;  %v1004_v45 = vadd.f32 %v1003_v7, %v844_v51  ;;  %v871_v18 = vadd.f32 %v3804_v2, %v708_v37  ;;  %v4457_v28 = vld [vmem:[#allocation8_spill] sm:$0xff]  ;;  %v4470_v37 = vld [vmem:[#allocation17_spill] sm:$0xff] }
 0x146   : > { %v1008_v14 = vpop.f32.mrf.mxu0  ;;  %v1138_v30 = vpop.f32.mrf.mxu1  ;;  %v716_v56 = vadd.f32 %v4457_v28, %v4456_v23 }
 0x147   : > { %v3871_v31 = vadd.f32 %v1138_v30, %v995_v35  ;;  %v1009_v61 = vadd.f32 %v1008_v14, %v851_v27  ;;  %v4458_v35 = vld [vmem:[#allocation12_spill] sm:$0xff] }
 0x148   : > { %v1010_v32 = vpop.f32.mrf.mxu0  ;;  %v1140_v43 = vpop.f32.mrf.mxu1  ;;  %v878_v15 = vadd.f32 %v4458_v35, %v714_v12 }
 0x149   : > { %v3876_v55 = vadd.f32 %v1140_v43, %v997_v33  ;;  %2204 = vrot.lane.b32.xlu1 %v3843_v20, %s3098_s19  ;;  %2186 = vrot.lane.b32.xlu0 %v3843_v20, %s3099_s20  ;;  %v1011_v38 = vadd.f32 %v1010_v32, %v853_v58  ;;  %v722_v33 = vadd.f32 %v4460_v21, %v4459_v22 }
 0x14a   : > { %v1015_v26 = vpop.f32.mrf.mxu0  ;;  %v1145_v41 = vpop.f32.mrf.mxu1  ;;  %v880_v32 = vadd.f32 %v4461_v29, %v716_v56 }
 0x14b   : > { %v3885_v46 = vadd.f32 %v1145_v41, %v1002_v3  ;;  %v1016_v19 = vadd.f32 %v1015_v26, %v860_v42  ;;  %v4462_v41 = vld [vmem:[#allocation5_spill] sm:$0xff]  ;;  %v4467_v42 = vld [vmem:[#allocation16_spill] sm:$0xff] }
 0x14c   : > { %v1017_v8 = vpop.f32.mrf.mxu0  ;;  %v1147_v16 = vpop.f32.mrf.mxu1  ;;  %v724_v27 = vadd.f32 %v4463_v36, %v4462_v41 }
 0x14d   : > { %v3890_v10 = vadd.f32 %v1147_v16, %v1004_v45  ;;  %2146 = vrot.lane.b32.xlu1 %v3848_v13, %s3097_s18  ;;  %2222 = vrot.lane.b32.xlu0 %v3843_v20, %s3100_s21  ;;  %v1018_v49 = vadd.f32 %v1017_v8, %v862_v0  ;;  %v4464_v45 = vld [vmem:[#allocation15_spill] sm:$0xff] }
 0x14e   : > { %v1022_v44 = vpop.f32.mrf.mxu0  ;;  %v1152_v52 = vpop.f32.mrf.mxu1  ;;  %v887_v57 = vadd.f32 %v4464_v45, %v722_v33 }
 0x14f   : > { %v3899_v62 = vadd.f32 %v1152_v52, %v1009_v61  ;;  %v1023_v48 = vadd.f32 %v1022_v44, %v869_v47  ;;  %v4465_v44 = vld [vmem:[#allocation6_spill] sm:$0xff]  ;;  %v4466_v52 = vld [vmem:[#allocation11_spill] sm:$0xff] }
 0x150   : > { %v1024_v11 = vpop.f32.mrf.mxu0  ;;  %v1154_v63 = vpop.f32.mrf.mxu1  ;;  %v730_v50 = vadd.f32 %v4466_v52, %v4465_v44 }
 0x151   : > { %v3904_v1 = vadd.f32 %v1154_v63, %v1011_v38  ;;  %2188 = vrot.lane.b32.xlu1 %v3848_v13, %s3099_s20  ;;  %2113 = vrot.lane.b32.xlu0 %v3848_v13, %s3095_s16  ;;  %v1025_v9 = vadd.f32 %v1024_v11, %v871_v18  ;;  %v889_v38 = vadd.f32 %v4467_v42, %v724_v27 }
 0x152   : > { %v1029_v53 = vpop.f32.mrf.mxu0  ;;  %v1159_v59 = vpop.f32.mrf.mxu1  ;;  %v896_v47 = vadd.f32 %v4470_v37, %v730_v50 }
 0x153   : > { %v1160_v17 = vadd.f32 %v1159_v59, %v1016_v19  ;;  %v1030_v43 = vadd.f32 %v1029_v53, %v878_v15  ;;  %v4468_v19 = vld [vmem:[#allocation7_spill] sm:$0xff]  ;;  %v4469_v53 = vld [vmem:[#allocation13_spill] sm:$0xff] }
 0x154   : > { %v1031_v5 = vpop.f32.mrf.mxu0  ;;  %v1161_v6 = vpop.f32.mrf.mxu1  ;;  %v732_v59 = vadd.f32 %v4469_v53, %v4468_v19 }
 0x155   : > { %2087 = vst [vmem:[#allocation2 + $0x90] sm:$0xff] %v1160_v17  ;;  %v1162_v7 = vadd.f32 %v1161_v6, %v1018_v49  ;;  %2224 = vrot.lane.b32.xlu1 %v3848_v13, %s3100_s21  ;;  %2128 = vrot.lane.b32.xlu0 %v3848_v13, %s3094_s15  ;;  %v1032_v8 = vadd.f32 %v1031_v5, %v880_v32 }
 0x156   : > { %v1036_v54 = vpop.f32.mrf.mxu0  ;;  %v1166_v25 = vpop.f32.mrf.mxu1  ;;  %v898_v6 = vadd.f32 %v3825_v39, %v732_v59 }
 0x157   : > { %2088 = vst [vmem:[#allocation2 + $0x98] sm:$0xff] %v1162_v7  ;;  %v3923_v14 = vadd.f32 %v1166_v25, %v1023_v48  ;;  %v1037_v34 = vadd.f32 %v1036_v54, %v887_v57 }
 0x158   : > { %v1038_v2 = vpop.f32.mrf.mxu0  ;;  %v1168_v30 = vpop.f32.mrf.mxu1 }
 0x159   : > { %v3928_v51 = vadd.f32 %v1168_v30, %v1025_v9  ;;  %2164 = vrot.lane.b32.xlu0 %v3848_v13, %s3096_s17  ;;  %v1039_v49 = vadd.f32 %v1038_v2, %v889_v38 }
 0x15a   : > { %v1043_v3 = vpop.f32.mrf.mxu0  ;;  %v1173_v26 = vpop.f32.mrf.mxu1 }
 0x15b   : > { %v3935_v16 = vadd.f32 %v1173_v26, %v1030_v43  ;;  %v1044_v18 = vadd.f32 %v1043_v3, %v896_v47 }
 0x15c   : > { %v1045_v58 = vpop.f32.mrf.mxu0  ;;  %v1175_v61 = vpop.f32.mrf.mxu1 }
 0x15d   : > { %v3940_v11 = vadd.f32 %v1175_v61, %v1032_v8  ;;  %2206 = vrot.lane.b32.xlu0 %v3848_v13, %s3098_s19  ;;  %v1046_v25 = vadd.f32 %v1045_v58, %v898_v6 }
 0x15e   : > { %v1180_v63 = vpop.f32.mrf.mxu1  ;;  %v1264_v0 = vpop.f32.mrf.mxu0 }
 0x15f   : > { %v3947_v17 = vadd.f32 %v1180_v63, %v1037_v34 }
 0x160   : > { %v1182_v12 = vpop.f32.mrf.mxu1  ;;  %v2763_v5 = vpop.f32.mrf.mxu0 }
 0x161   : > { %v3950_v48 = vadd.f32 %v1182_v12, %v1039_v49 }
 0x162   : > { %v1187_v7 = vpop.f32.mrf.mxu1  ;;  %v1274_v54 = vpop.f32.mrf.mxu0 }
 0x163   : > { %4471 = vst [vmem:[#allocation3_spill] sm:$0xff] %v3950_v48  ;;  %v3952_v23 = vadd.f32 %v1187_v7, %v1044_v18 }
 0x164   : > { %v1189_v28 = vpop.f32.mrf.mxu1  ;;  %v2766_v56 = vpop.f32.mrf.mxu0 }
 0x165   : > { %4472 = vst [vmem:[#allocation8_spill] sm:$0xff] %v3952_v23  ;;  %v3954_v35 = vadd.f32 %v1189_v28, %v1046_v25 }
 0x166   : > { %v1284_v15 = vpop.f32.mrf.mxu0  ;;  %v1440_v9 = vpop.f32.mrf.mxu1 }
 0x167   : > { %4473 = vst [vmem:[#allocation12_spill] sm:$0xff] %v3954_v35  ;;  %v3956_v2 = vadd.f32 %v1440_v9, %v1264_v0 }
 0x168   : > { %v2769_v30 = vpop.f32.mrf.mxu0  ;;  %v2798_v22 = vpop.f32.mrf.mxu1 }
 0x16a   : > { %v1294_v21 = vpop.f32.mrf.mxu0  ;;  %v1446_v39 = vpop.f32.mrf.mxu1 }
 0x16b   : > { %v3958_v33 = vadd.f32 %v1446_v39, %v1274_v54 }
 0x16c   : > { %v2772_v29 = vpop.f32.mrf.mxu0  ;;  %v2801_v32 = vpop.f32.mrf.mxu1 }
 0x16e   : > { %v1304_v43 = vpop.f32.mrf.mxu0  ;;  %v1452_v3 = vpop.f32.mrf.mxu1 }
 0x16f   : > { %v3960_v26 = vadd.f32 %v1452_v3, %v1284_v15 }
 0x170   : > { %v2775_v41 = vpop.f32.mrf.mxu0  ;;  %v2804_v36 = vpop.f32.mrf.mxu1 }
 0x172   : > { %v1314_v27 = vpop.f32.mrf.mxu0  ;;  %v1458_v45 = vpop.f32.mrf.mxu1 }
 0x173   : > { %v3962_v57 = vadd.f32 %v1458_v45, %v1294_v21 }
 0x174   : > { %v2778_v8 = vpop.f32.mrf.mxu0  ;;  %v2807_v58 = vpop.f32.mrf.mxu1 }
 0x176   : > { %v1324_v61 = vpop.f32.mrf.mxu0  ;;  %v1464_v44 = vpop.f32.mrf.mxu1 }
 0x177   : > { %v3964_v52 = vadd.f32 %v1464_v44, %v1304_v43 }
 0x178   : > { %v2781_v50 = vpop.f32.mrf.mxu0  ;;  %v2810_v42 = vpop.f32.mrf.mxu1 }
 0x17a   : > { %v1334_v38 = vpop.f32.mrf.mxu0  ;;  %v1470_v34 = vpop.f32.mrf.mxu1 }
 0x17b   : > { %v3966_v63 = vadd.f32 %v1470_v34, %v1314_v27 }
 0x17c   : > { %v2784_v0 = vpop.f32.mrf.mxu0  ;;  %v2813_v19 = vpop.f32.mrf.mxu1 }
 0x17e   : > { %v1344_v53 = vpop.f32.mrf.mxu0  ;;  %v1476_v59 = vpop.f32.mrf.mxu1 }
 0x17f   : > { %v3968_v37 = vadd.f32 %v1476_v59, %v1324_v61 }
 0x180   : > { %v2787_v47 = vpop.f32.mrf.mxu0  ;;  %v2816_v49 = vpop.f32.mrf.mxu1 }
 0x182   : > { %v1354_v12 = vpop.f32.mrf.mxu0  ;;  %v1482_v5 = vpop.f32.mrf.mxu1 }
 0x183   : > { %v3970_v6 = vadd.f32 %v1482_v5, %v1334_v38 }
 0x184   : > { %v2790_v18 = vpop.f32.mrf.mxu0  ;;  %v2819_v7 = vpop.f32.mrf.mxu1 }
 0x186   : > { %v1364_v54 = vpop.f32.mrf.mxu0  ;;  %v1488_v25 = vpop.f32.mrf.mxu1 }
 0x187   : > { %v3972_v28 = vadd.f32 %v1488_v25, %v1344_v53 }
 0x188   : > { %v2793_v56 = vpop.f32.mrf.mxu0  ;;  %v2822_v15 = vpop.f32.mrf.mxu1 }
 0x18a   : > { %v1494_v9 = vpop.f32.mrf.mxu1  ;;  %v1574_v30 = vpop.f32.mrf.mxu0 }
 0x18b   : > { %v3974_v22 = vadd.f32 %v1494_v9, %v1354_v12 }
 0x18c   : > { %v2825_v21 = vpop.f32.mrf.mxu1  ;;  %v2833_v39 = vpop.f32.mrf.mxu0 }
 0x18e   : > { %v1500_v29 = vpop.f32.mrf.mxu1  ;;  %v1581_v32 = vpop.f32.mrf.mxu0 }
 0x18f   : > { %v3976_v43 = vadd.f32 %v1500_v29, %v1364_v54 }
 0x190   : > { %v2828_v3 = vpop.f32.mrf.mxu1  ;;  %v2836_v41 = vpop.f32.mrf.mxu0 }
 0x192   : > { %v1588_v36 = vpop.f32.mrf.mxu0  ;;  %v1718_v27 = vpop.f32.mrf.mxu1 }
 0x194   : > { %v2839_v45 = vpop.f32.mrf.mxu0  ;;  %v2868_v8 = vpop.f32.mrf.mxu1 }
 0x196   : > { %v1595_v58 = vpop.f32.mrf.mxu0  ;;  %v1726_v61 = vpop.f32.mrf.mxu1 }
 0x198   : > { %v2842_v44 = vpop.f32.mrf.mxu0  ;;  %v2871_v50 = vpop.f32.mrf.mxu1 }
 0x19a   : > { %v3978_v42 = vpop.f32.mrf.mxu0  ;;  %v1734_v38 = vpop.f32.mrf.mxu1 }
 0x19c   : > { %v2845_v34 = vpop.f32.mrf.mxu0  ;;  %v2874_v0 = vpop.f32.mrf.mxu1 }
 0x19e   : > { %v3980_v19 = vpop.f32.mrf.mxu0  ;;  %v1742_v53 = vpop.f32.mrf.mxu1 }
 0x1a0   : > { %v2848_v59 = vpop.f32.mrf.mxu0  ;;  %v2877_v47 = vpop.f32.mrf.mxu1 }
 0x1a2   : > { %v3982_v49 = vpop.f32.mrf.mxu0  ;;  %v1750_v12 = vpop.f32.mrf.mxu1 }
 0x1a4   : > { %v2851_v5 = vpop.f32.mrf.mxu0  ;;  %v2880_v18 = vpop.f32.mrf.mxu1 }
 0x1a5   : > { %v1575_v18 = vadd.f32 %v1574_v30, %v3956_v2 }
 0x1a6   : > { %v3984_v7 = vpop.f32.mrf.mxu0  ;;  %v3986_v54 = vpop.f32.mrf.mxu1 }
 0x1a8   : > { %v2854_v25 = vpop.f32.mrf.mxu0  ;;  %v2883_v56 = vpop.f32.mrf.mxu1 }
 0x1aa   : > { %v3988_v15 = vpop.f32.mrf.mxu0  ;;  %v3990_v9 = vpop.f32.mrf.mxu1 }
 0x1ac   : > { %v2857_v21 = vpop.f32.mrf.mxu0  ;;  %v2886_v39 = vpop.f32.mrf.mxu1 }
 0x1ad   : > { %v1719_v21 = vadd.f32 %v1718_v27, %v1575_v18 }
 0x1ae   : > { %v3992_v29 = vpop.f32.mrf.mxu0  ;;  %v3994_v3 = vpop.f32.mrf.mxu1 }
 0x1b0   : > { %v2860_v41 = vpop.f32.mrf.mxu0  ;;  %v2889_v45 = vpop.f32.mrf.mxu1 }
 0x1b1   : > { %v1582_v45 = vadd.f32 %v1581_v32, %v3958_v33  ;;  %v1596_v33 = vadd.f32 %v1595_v58, %v3962_v57 }
 0x1b2   : > { %v3996_v8 = vpop.f32.mrf.mxu0  ;;  %v3998_v44 = vpop.f32.mrf.mxu1 }
 0x1b4   : > { %v2863_v50 = vpop.f32.mrf.mxu0  ;;  %v2892_v34 = vpop.f32.mrf.mxu1 }
 0x1b5   : > { %v1727_v50 = vadd.f32 %v1726_v61, %v1582_v45 }
 0x1b6   : > { %v4000_v0 = vpop.f32.mrf.mxu1  ;;  %v1872_v59 = vpop.f32.mrf.mxu0 }
 0x1b7   : > { %v1873_v4 = vadd.f32 %v1872_v59, %v1719_v21 }
 0x1b8   : > { %v2895_v47 = vpop.f32.mrf.mxu1  ;;  %v2903_v5 = vpop.f32.mrf.mxu0 }
 0x1b9   : > { %v1589_v47 = vadd.f32 %v1588_v36, %v3960_v26  ;;  %v1603_v36 = vadd.f32 %v3978_v42, %v3964_v52 }
 0x1ba   : > { %v4003_v25 = vpop.f32.mrf.mxu1  ;;  %v1878_v56 = vpop.f32.mrf.mxu0 }
 0x1bb   : > { %v1879_v5 = vadd.f32 %v1878_v56, %v1727_v50  ;;  %v1735_v27 = vadd.f32 %v1734_v38, %v1589_v47  ;;  %v1751_v21 = vadd.f32 %v1750_v12, %v1603_v36 }
 0x1bc   : > { %v2898_v39 = vpop.f32.mrf.mxu1  ;;  %v2906_v41 = vpop.f32.mrf.mxu0 }
 0x1be   : > { %v1884_v40 = vpop.f32.mrf.mxu0  ;;  %v2004_v35 = vpop.f32.mrf.mxu1 }
 0x1bf   : > { %v2005_v34 = vadd.f32 %v2004_v35, %v1873_v4  ;;  %v1885_v32 = vadd.f32 %v1884_v40, %v1735_v27 }
 0x1c0   : > { %v2909_v23 = vpop.f32.mrf.mxu0  ;;  %v2938_v48 = vpop.f32.mrf.mxu1 }
 0x1c1   : > { %2071 = vst.msk [vmem:[#allocation2 + $0x10] sm:$0xff] %vm2070_vm3, %v2005_v34  ;;  %v1743_v23 = vadd.f32 %v1742_v53, %v1596_v33  ;;  %v1610_v53 = vadd.f32 %v3980_v19, %v3966_v63 }
 0x1c2   : > { %v1890_v2 = vpop.f32.mrf.mxu0  ;;  %v2010_v30 = vpop.f32.mrf.mxu1 }
 0x1c3   : > { %v2011_v18 = vadd.f32 %v2010_v30, %v1879_v5  ;;  %v1891_v59 = vadd.f32 %v1890_v2, %v1743_v23  ;;  %v1759_v12 = vadd.f32 %v3986_v54, %v1610_v53  ;;  %v1617_v2 = vadd.f32 %v3982_v49, %v3968_v37 }
 0x1c4   : > { %v2912_v39 = vpop.f32.mrf.mxu0  ;;  %v2941_v41 = vpop.f32.mrf.mxu1  ;;  %v1631_v23 = vadd.f32 %v3988_v15, %v3972_v28  ;;  %v1638_v28 = vadd.f32 %v3992_v29, %v3974_v22 }
 0x1c5   : > { %2074 = vst.msk [vmem:[#allocation2 + $0x28] sm:$0xff] %vm2070_vm3, %v2011_v18  ;;  %v1767_v27 = vadd.f32 %v3990_v9, %v1617_v2  ;;  %v1624_v41 = vadd.f32 %v3984_v7, %v3970_v6 }
 0x1c6   : > { %v1896_v61 = vpop.f32.mrf.mxu0  ;;  %v2016_v4 = vpop.f32.mrf.mxu1 }
 0x1c7   : > { %v2017_v48 = vadd.f32 %v2016_v4, %v1885_v32  ;;  %v1897_v50 = vadd.f32 %v1896_v61, %v1751_v21  ;;  %v1775_v32 = vadd.f32 %v3994_v3, %v1624_v41  ;;  %v1783_v3 = vadd.f32 %v3998_v44, %v1631_v23 }
 0x1c8   : > { %v2915_v35 = vpop.f32.mrf.mxu0  ;;  %v2944_v26 = vpop.f32.mrf.mxu1 }
 0x1c9   : > { %2077 = vst.msk [vmem:[#allocation2 + $0x40] sm:$0xff] %vm2070_vm3, %v2017_v48 }
 0x1ca   : > { %v1902_v38 = vpop.f32.mrf.mxu0  ;;  %v2022_v56 = vpop.f32.mrf.mxu1 }
 0x1cb   : > { %v2023_v45 = vadd.f32 %v2022_v56, %v1891_v59  ;;  %v1903_v63 = vadd.f32 %v1902_v38, %v1759_v12  ;;  %v1791_v56 = vadd.f32 %v4000_v0, %v1638_v28 }
 0x1cc   : > { %v2918_v57 = vpop.f32.mrf.mxu0  ;;  %v2947_v40 = vpop.f32.mrf.mxu1  ;;  %v4013_v58 = vld [vmem:[#allocation2 + $0x28] sm:$0xff] }
 0x1cd   : > { %2080 = vst.msk [vmem:[#allocation2 + $0x58] sm:$0xff] %vm2070_vm3, %v2023_v45  ;;  %2115 = vrot.lane.b32.xlu1 %v4013_v58, %s3095_s16  ;;  %2148 = vrot.lane.b32.xlu0 %v4013_v58, %s3097_s18  ;;  %v1645_v57 = vadd.f32 %v3996_v8, %v3976_v43 }
 0x1ce   : > { %v1908_v52 = vpop.f32.mrf.mxu0  ;;  %v2028_v42 = vpop.f32.mrf.mxu1 }
 0x1cf   : > { %v2029_v34 = vadd.f32 %v2028_v42, %v1897_v50  ;;  %v1909_v37 = vadd.f32 %v1908_v52, %v1767_v27  ;;  %v1799_v29 = vadd.f32 %v4003_v25, %v1645_v57  ;;  %v2127_v52 = vpop.permute.xlu1 %2126  ;;  %v2104_v57 = vld [vmem:[#allocation2 + $0x10] sm:$0xff] }
 0x1d0   : > { %v2921_v47 = vpop.f32.mrf.mxu0  ;;  %v2950_v5 = vpop.f32.mrf.mxu1 }
 0x1d1   : > { %2083 = vst.msk [vmem:[#allocation2 + $0x70] sm:$0xff] %vm2070_vm3, %v2029_v34  ;;  %2130 = vrot.lane.b32.xlu1 %v4013_v58, %s3094_s15  ;;  %2190 = vrot.lane.b32.xlu0 %v4013_v58, %s3099_s20 }
 0x1d2   : > { %v1914_v19 = vpop.f32.mrf.mxu0  ;;  %v2034_v30 = vpop.f32.mrf.mxu1 }
 0x1d3   : > { %v2035_v54 = vadd.f32 %v2034_v30, %v1903_v63  ;;  %v1915_v6 = vadd.f32 %v1914_v19, %v1775_v32  ;;  %v2163_v12 = vpop.permute.xlu1 %2162  ;;  %v4477_v19 = vld [vmem:[#allocation18_spill] sm:$0xff] }
 0x1d4   : > { %v2924_v18 = vpop.f32.mrf.mxu0  ;;  %v2953_v39 = vpop.f32.mrf.mxu1  ;;  %v4102_v30 = vmul.f32 %v2127_v52, %v4477_v19 }
 0x1d5   : > { %2086 = vst.msk [vmem:[#allocation2 + $0x88] sm:$0xff] %vm2070_vm3, %v2035_v54  ;;  %2166 = vrot.lane.b32.xlu1 %v4013_v58, %s3096_s17  ;;  %2226 = vrot.lane.b32.xlu0 %v4013_v58, %s3100_s21 }
 0x1d6   : > { %v1920_v49 = vpop.f32.mrf.mxu0  ;;  %v2040_v33 = vpop.f32.mrf.mxu1 }
 0x1d7   : > { %v2041_v9 = vadd.f32 %v2040_v33, %v1909_v37  ;;  %v1921_v15 = vadd.f32 %v1920_v49, %v1783_v3  ;;  %v2205_v47 = vpop.permute.xlu1 %2204 }
 0x1d8   : > { %v2927_v61 = vpop.f32.mrf.mxu0  ;;  %v2956_v4 = vpop.f32.mrf.mxu1 }
 0x1d9   : > { %2089 = vst.msk [vmem:[#allocation2 + $0xa0] sm:$0xff] %vm2070_vm3, %v2041_v9  ;;  %2240 = vrot.lane.b32.xlu1 %v3843_v20, %s3101_s22  ;;  %2242 = vrot.lane.b32.xlu0 %v3848_v13, %s3101_s22  ;;  %v4117_v9 = vmul.f32 %v2163_v12, %v4477_v19 }
 0x1da   : > { %v1926_v7 = vpop.f32.mrf.mxu0  ;;  %v2046_v48 = vpop.f32.mrf.mxu1 }
 0x1db   : > { %v2047_v35 = vadd.f32 %v2046_v48, %v1915_v6  ;;  %v1927_v22 = vadd.f32 %v1926_v7, %v1791_v56  ;;  %v2147_v2 = vpop.permute.xlu1 %2146  ;;  %v4478_v6 = vld [vmem:[#allocation19_spill] sm:$0xff] }
 0x1dc   : > { %v2930_v26 = vpop.f32.mrf.mxu0  ;;  %v2959_v36 = vpop.f32.mrf.mxu1 }
 0x1dd   : > { %2092 = vst.msk [vmem:[#allocation2 + $0xb8] sm:$0xff] %vm2070_vm3, %v2047_v35  ;;  %2208 = vrot.lane.b32.xlu1 %v4013_v58, %s3098_s19  ;;  %2273 = vrot.lane.b32.xlu0 %v3857_v24, %s3095_s16  ;;  %v4127_v35 = vmul.f32 %v3843_v20, %v4477_v19 }
 0x1de   : > { %v1932_v59 = vpop.f32.mrf.mxu0  ;;  %v2052_v38 = vpop.f32.mrf.mxu1 }
 0x1df   : > { %v2053_v44 = vadd.f32 %v2052_v38, %v1921_v15  ;;  %v1933_v53 = vadd.f32 %v1932_v59, %v1799_v29  ;;  %v2189_v54 = vpop.permute.xlu1 %2188 }
 0x1e0   : > { %v2962_v21 = vpop.f32.mrf.mxu1  ;;  %v2933_v45 = vpop.f32.mrf.mxu0 }
 0x1e1   : > { %2095 = vst.msk [vmem:[#allocation2 + $0xd0] sm:$0xff] %vm2070_vm3, %v2053_v44  ;;  %2244 = vrot.lane.b32.xlu1 %v4013_v58, %s3101_s22  ;;  %2307 = vrot.lane.b32.xlu0 %v3876_v55, %s3094_s15  ;;  %v4474_v55 = vld [vmem:[#allocation3_spill] sm:$0xff] }
 0x1e2   : > { %v2058_v24 = vpop.f32.mrf.mxu1 }
 0x1e3   : > { %v2059_v40 = vadd.f32 %v2058_v24, %v1927_v22  ;;  %v2225_v49 = vpop.permute.xlu1 %2224 }
 0x1e4   : > { %v2965_v0 = vpop.f32.mrf.mxu1 }
 0x1e5   : > { %2098 = vst.msk [vmem:[#allocation2 + $0xe8] sm:$0xff] %vm2070_vm3, %v2059_v40  ;;  %2275 = vrot.lane.b32.xlu1 %v3862_v60, %s3095_s16  ;;  %2340 = vrot.lane.b32.xlu0 %v3885_v46, %s3097_s18  ;;  %v2269_v60 = vld [vmem:[#allocation2 + $0x40] sm:$0xff]  ;;  %v2298_v46 = vld [vmem:[#allocation2 + $0x58] sm:$0xff] }
 0x1e6   : > { %v2064_v43 = vpop.f32.mrf.mxu1 }
 0x1e7   : > { %v2065_v8 = vadd.f32 %v2064_v43, %v1933_v53 }
 0x1e8   : > { %v2968_v50 = vpop.f32.mrf.mxu1 }
 0x1e9   : > { %2101 = vst.msk [vmem:[#allocation2 + $0x100] sm:$0xff] %vm2070_vm3, %v2065_v8  ;;  %2305 = vrot.lane.b32.xlu1 %v3871_v31, %s3094_s15  ;;  %2377 = vrot.lane.b32.xlu0 %v3904_v1, %s3096_s17  ;;  %v2333_v31 = vld [vmem:[#allocation2 + $0x70] sm:$0xff] }
 0x1ec   : > { %v2494_v1 = vld [vmem:[#allocation2 + $0xe8] sm:$0xff] }
 0x1ed   : > { %2342 = vrot.lane.b32.xlu1 %v3890_v10, %s3097_s18  ;;  %2431 = vrot.lane.b32.xlu0 %v3923_v14, %s3099_s20  ;;  %v2424_v10 = vld [vmem:[#allocation2 + $0xb8] sm:$0xff]  ;;  %v4475_v14 = vld [vmem:[#allocation8_spill] sm:$0xff] }
 0x1f1   : > { %2375 = vrot.lane.b32.xlu1 %v3899_v62, %s3096_s17  ;;  %2468 = vrot.lane.b32.xlu0 %v3940_v11, %s3098_s19  ;;  %v2368_v62 = vld [vmem:[#allocation2 + $0x88] sm:$0xff]  ;;  %v2529_v11 = vld [vmem:[#allocation2 + $0x100] sm:$0xff] }
 0x1f5   : > { %2433 = vrot.lane.b32.xlu1 %v3928_v51, %s3099_s20  ;;  %2501 = vrot.lane.b32.xlu0 %v3947_v17, %s3100_s21  ;;  %v4476_v51 = vld [vmem:[#allocation12_spill] sm:$0xff]  ;;  %v2112_v17 = vpop.permute.xlu0 %2111 }
 0x1f6   : > { %v4105_v27 = vmul.f32 %v2112_v17, %v4477_v19 }
 0x1f8   : > { %v2141_v41 = vmax.f32 %v4105_v27, %v4102_v30 }
 0x1f9   : > { %2466 = vrot.lane.b32.xlu1 %v3935_v16, %s3098_s19  ;;  %2277 = vrot.lane.b32.xlu0 %v2269_v60, %s3095_s16  ;;  %v2459_v16 = vld [vmem:[#allocation2 + $0xd0] sm:$0xff]  ;;  %v2145_v25 = vpop.permute.xlu0 %2144 }
 0x1fa   : > { %v4108_v39 = vmul.f32 %v2145_v25, %v4477_v19  ;;  %v2151_v28 = vsel %vm2150_vm8, %v2145_v25, %v2147_v2 }
 0x1fb   : > { %v4149_v29 = vmul.f32 %v2151_v28, %v4478_v6 }
 0x1fc   : > { %v2159_v37 = vmax.f32 %v2141_v41, %v4108_v39 }
 0x1fd   : > { %2503 = vrot.lane.b32.xlu1 %v4474_v55, %s3100_s21  ;;  %2344 = vrot.lane.b32.xlu0 %v2333_v31, %s3097_s18  ;;  %v2187_v42 = vpop.permute.xlu0 %2186 }
 0x1fe   : > { %v2177_v4 = vmax.f32 %v2159_v37, %v4117_v9  ;;  %v2193_v23 = vsel %vm2192_vm6, %v2187_v42, %v2189_v54 }
 0x1ff   : > { %v4136_v15 = vmul.f32 %v2193_v23, %v4477_v19 }
 0x200   : > { %v2183_v38 = vmax.f32 %v2177_v4, %v4127_v35 }
 0x201   : > { %2309 = vrot.lane.b32.xlu1 %v2298_v46, %s3094_s15  ;;  %2435 = vrot.lane.b32.xlu0 %v2424_v10, %s3099_s20  ;;  %v2223_v34 = vpop.permute.xlu0 %2222 }
 0x202   : > { %v2201_v53 = vmax.f32 %v2183_v38, %v4136_v15  ;;  %v2229_v43 = vsel %vm2228_vm10, %v2223_v34, %v2225_v49 }
 0x205   : > { %2379 = vrot.lane.b32.xlu1 %v2368_v62, %s3096_s17  ;;  %2505 = vrot.lane.b32.xlu0 %v2494_v1, %s3100_s21  ;;  %v2114_v5 = vpop.permute.xlu0 %2113 }
 0x206   : > { %v2118_v61 = vsel %vm2117_vm5, %v2112_v17, %v2114_v5  ;;  %v4176_v17 = vmul.f32 %v4013_v58, %v2104_v57 }
 0x207   : > { %v4130_v26 = vmul.f32 %v2118_v61, %v4478_v6 }
 0x209   : > { %2536 = vrot.lane.b32.xlu1 %v4475_v14, %s3101_s22  ;;  %2538 = vrot.lane.b32.xlu0 %v4476_v51, %s3101_s22  ;;  %v2129_v63 = vpop.permute.xlu0 %2128  ;;  %v4171_v51 = vmul.f32 %v2229_v43, %v4477_v19 }
 0x20a   : > { %v2133_v32 = vsel %vm2132_vm4, %v2127_v52, %v2129_v63 }
 0x20b   : > { %v4123_v7 = vmul.f32 %v2133_v32, %v4478_v6 }
 0x20d   : > { %2470 = vrot.lane.b32.xlu1 %v2459_v16, %s3098_s19  ;;  %v2165_v18 = vpop.permute.xlu0 %2164  ;;  %v2142_v20 = vmax.f32 %v4130_v26, %v4123_v7 }
 0x20e   : > { %v2169_v21 = vsel %vm2168_vm9, %v2163_v12, %v2165_v18  ;;  %v4181_v12 = vmul.f32 %v3848_v13, %v4478_v6 }
 0x20f   : > { %v2160_v8 = vmax.f32 %v2142_v20, %v4149_v29  ;;  %v4159_v50 = vmul.f32 %v2169_v21, %v4478_v6 }
 0x211   : > { %2540 = vrot.lane.b32.xlu1 %v2529_v11, %s3101_s22  ;;  %v4113_v33 = vpop.permute.xlu0 %2206  ;;  %v2178_v11 = vmax.f32 %v2160_v8, %v4159_v50 }
 0x212   : > { %v2211_v36 = vsel %vm2210_vm7, %v2205_v47, %v4113_v33 }
 0x213   : > { %v4144_v45 = vmul.f32 %v2211_v36, %v4477_v19 }
 0x215   : > { %v2219_v10 = vmax.f32 %v2201_v53, %v4144_v45 }
 0x217   : > { %v2237_v34 = vmax.f32 %v2219_v10, %v4171_v51 }
 0x23f   : > { %v2116_v48 = vpop.permute.xlu1 %2115  ;;  %v2149_v3 = vpop.permute.xlu0 %2148 }
 0x240   : > { %v2119_v59 = vsel %vm2117_vm5, %v2114_v5, %v2116_v48  ;;  %v2152_v22 = vsel %vm2150_vm8, %v2147_v2, %v2149_v3 }
 0x241   : > { %v4151_v40 = vmul.f32 %v2119_v59, %v2104_v57  ;;  %v4161_v60 = vmul.f32 %v2152_v22, %v2104_v57 }
 0x243   : > { %v2131_v56 = vpop.permute.xlu1 %2130  ;;  %v2191_v44 = vpop.permute.xlu0 %2190 }
 0x244   : > { %v2134_v24 = vsel %vm2132_vm4, %v2129_v63, %v2131_v56  ;;  %v2194_v16 = vsel %vm2192_vm6, %v2189_v54, %v2191_v44  ;;  %v4188_v2 = vmul.f32 %v2191_v44, %v2104_v57  ;;  %v2184_v54 = vmax.f32 %v2178_v11, %v4181_v12 }
 0x245   : > { %v4153_v0 = vmul.f32 %v2134_v24, %v2104_v57  ;;  %v4186_v5 = vmul.f32 %v2194_v16, %v4478_v6 }
 0x247   : > { %v2143_v31 = vmax.f32 %v4151_v40, %v4153_v0  ;;  %v2167_v55 = vpop.permute.xlu1 %2166  ;;  %v2227_v46 = vpop.permute.xlu0 %2226 }
 0x248   : > { %v2170_v62 = vsel %vm2168_vm9, %v2165_v18, %v2167_v55  ;;  %v2230_v18 = vsel %vm2228_vm10, %v2225_v49, %v2227_v46  ;;  %v4215_v3 = vmul.f32 %v2227_v46, %v2104_v57 }
 0x249   : > { %v2161_v1 = vmax.f32 %v2143_v31, %v4161_v60  ;;  %v4168_v14 = vmul.f32 %v2170_v62, %v2104_v57  ;;  %v4213_v48 = vmul.f32 %v2230_v18, %v4478_v6 }
 0x24b   : > { %v2179_v25 = vmax.f32 %v2161_v1, %v4168_v14  ;;  %v2241_v52 = vpop.permute.xlu1 %2240  ;;  %v2243_v42 = vpop.permute.xlu0 %2242 }
 0x24c   : > { %v2247_v47 = vsel %vm2246_vm11, %v2241_v52, %v2243_v42 }
 0x24d   : > { %v2185_v58 = vmax.f32 %v2179_v25, %v4176_v17  ;;  %v4192_v63 = vmul.f32 %v2247_v47, %v4477_v19  ;;  %v2202_v19 = vmax.f32 %v2184_v54, %v4186_v5 }
 0x24f   : > { %v4197_v13 = vmax.f32 %v2237_v34, %v4192_v63  ;;  %v2209_v41 = vpop.permute.xlu1 %2208  ;;  %v2203_v37 = vmax.f32 %v2185_v58, %v4188_v2  ;;  %v4200_v32 = vpop.permute.xlu0 %2273 }
 0x250   : > { %v2212_v61 = vsel %vm2210_vm7, %v4113_v33, %v2209_v41  ;;  %v4204_v4 = vmul.f32 %v2209_v41, %v2104_v57 }
 0x251   : > { %v4208_v23 = vmul.f32 %v2212_v61, %v4478_v6  ;;  %v2258_v49 = vsub.f32 %v4105_v27, %v4197_v13  ;;  %v2287_v33 = vsub.f32 %v4102_v30, %v4197_v13  ;;  %v2322_v56 = vsub.f32 %v4108_v39, %v4197_v13 }
 0x252   : > { %v2221_v36 = vmax.f32 %v2203_v37, %v4204_v4  ;;  %v2357_v27 = vsub.f32 %v4117_v9, %v4197_v13  ;;  %v2392_v43 = vsub.f32 %v4127_v35, %v4197_v13 }
 0x253   : > { %v2220_v28 = vmax.f32 %v2202_v19, %v4208_v23  ;;  %v2261_v59 = vmul.f32 1.442695, %v2258_v49  ;;  %v2245_v38 = vpop.permute.xlu1 %2244  ;;  %v4221_v20 = vpop.permute.xlu0 %2307  ;;  %v2290_v24 = vmul.f32 1.442695, %v2287_v33  ;;  %v2325_v31 = vmul.f32 1.442695, %v2322_v56 }
 0x254   : > { %v2239_v44 = vmax.f32 %v2221_v36, %v4215_v3  ;;  %v2248_v21 = vsel %vm2246_vm11, %v2243_v42, %v2245_v38  ;;  %v4229_v22 = vmul.f32 %v2245_v38, %v2104_v57  ;;  %v2360_v55 = vmul.f32 1.442695, %v2357_v27 }
 0x255   : > { %v2238_v30 = vmax.f32 %v2220_v28, %v4213_v48  ;;  %v4233_v53 = vmul.f32 %v2248_v21, %v4478_v6  ;;  %3006 = vpow2.f32 %v2261_v59  ;;  %v2395_v10 = vmul.f32 1.442695, %v2392_v43 }
 0x256   : > { %v4245_v57 = vmax.f32 %v2239_v44, %v4229_v22  ;;  %3008 = vpow2.f32 %v2290_v24  ;;  %v2483_v42 = vsub.f32 %v4171_v51, %v4197_v13 }
 0x257   : > { %v4238_v39 = vmax.f32 %v2238_v30, %v4233_v53  ;;  %v4240_v9 = vpop.permute.xlu1 %2275  ;;  %v4242_v8 = vpop.permute.xlu0 %2340  ;;  %3010 = vpow2.f32 %v2325_v31 }
 0x258   : > { %3012 = vpow2.f32 %v2360_v55  ;;  %v2289_v58 = vsub.f32 %v4153_v0, %v4245_v57  ;;  %v2324_v18 = vsub.f32 %v4161_v60, %v4245_v57  ;;  %v2486_v51 = vmul.f32 1.442695, %v2483_v42 }
 0x259   : > { %v2259_v6 = vsub.f32 %v4130_v26, %v4238_v39  ;;  %v2288_v35 = vsub.f32 %v4123_v7, %v4238_v39  ;;  %v2323_v46 = vsub.f32 %v4149_v29, %v4238_v39  ;;  %v2358_v62 = vsub.f32 %v4159_v50, %v4238_v39 }
 0x25a   : > { %v2413_v26 = vsub.f32 %v4136_v15, %v4197_v13  ;;  %v2448_v7 = vsub.f32 %v4144_v45, %v4197_v13  ;;  %3014 = vpow2.f32 %v2395_v10  ;;  %v2260_v29 = vsub.f32 %v4151_v40, %v4245_v57 }
 0x25b   : > { %v2263_v1 = vmul.f32 1.442695, %v2259_v6  ;;  %v4255_v16 = vpop.permute.xlu1 %2305  ;;  %v2292_v11 = vmul.f32 1.442695, %v2288_v35  ;;  %v4257_v25 = vpop.permute.xlu0 %2377  ;;  %v2327_v52 = vmul.f32 1.442695, %v2323_v46  ;;  %v2518_v45 = vsub.f32 %v4192_v63, %v4197_v13 }
 0x25c   : > { %v2362_v50 = vmul.f32 1.442695, %v2358_v62  ;;  %v2416_v15 = vmul.f32 1.442695, %v2413_v26  ;;  %v2451_v54 = vmul.f32 1.442695, %v2448_v7  ;;  %v2393_v41 = vsub.f32 %v4181_v12, %v4238_v39 }
 0x25d   : > { %3016 = vpow2.f32 %v2263_v1  ;;  %v2265_v40 = vmul.f32 1.442695, %v2260_v29  ;;  %v2294_v0 = vmul.f32 1.442695, %v2289_v58  ;;  %v2414_v63 = vsub.f32 %v4186_v5, %v4238_v39 }
 0x25e   : > { %3018 = vpow2.f32 %v2292_v11  ;;  %v2521_v19 = vmul.f32 1.442695, %v2518_v45  ;;  %v2359_v60 = vsub.f32 %v4168_v14, %v4245_v57  ;;  %v2329_v36 = vmul.f32 1.442695, %v2324_v18 }
 0x25f   : > { %v4267_v34 = vpop.permute.xlu1 %2342  ;;  %v4269_v47 = vpop.permute.xlu0 %2431  ;;  %3020 = vpow2.f32 %v2327_v52  ;;  %v2397_v12 = vmul.f32 1.442695, %v2393_v41  ;;  %v2394_v33 = vsub.f32 %v4176_v17, %v4245_v57  ;;  %v2415_v5 = vsub.f32 %v4188_v2, %v4245_v57 }
 0x260   : > { %3022 = vpow2.f32 %v2362_v50  ;;  %v2418_v38 = vmul.f32 1.442695, %v2414_v63  ;;  %v2364_v14 = vmul.f32 1.442695, %v2359_v60  ;;  %v2449_v44 = vsub.f32 %v4208_v23, %v4238_v39 }
 0x261   : > { %3024 = vpow2.f32 %v2416_v15  ;;  %v2484_v17 = vsub.f32 %v4213_v48, %v4238_v39  ;;  %v2399_v43 = vmul.f32 1.442695, %v2394_v33  ;;  %v2450_v2 = vsub.f32 %v4204_v4, %v4245_v57 }
 0x262   : > { %v3007_v13 = vpop.eup %3006  ;;  %3026 = vpow2.f32 %v2451_v54  ;;  %v2519_v55 = vsub.f32 %v4233_v53, %v4238_v39  ;;  %v2420_v35 = vmul.f32 1.442695, %v2415_v5  ;;  %v2485_v10 = vsub.f32 %v4215_v3, %v4245_v57 }
 0x263   : > { %v4279_v37 = vpop.permute.xlu1 %2375  ;;  %v4281_v61 = vpop.permute.xlu0 %2468  ;;  %3028 = vpow2.f32 %v2265_v40  ;;  %v2453_v62 = vmul.f32 1.442695, %v2449_v44  ;;  %v2488_v4 = vmul.f32 1.442695, %v2484_v17  ;;  %v2520_v11 = vsub.f32 %v4229_v22, %v4245_v57 }
 0x264   : > { %v3009_v49 = vpop.eup %3008  ;;  %3030 = vpow2.f32 %v2486_v51  ;;  %v2455_v26 = vmul.f32 1.442695, %v2450_v2  ;;  %v2284_v52 = vmul.f32 %v3007_v13, %v4200_v32  ;;  %v2523_v29 = vmul.f32 1.442695, %v2519_v55 }
 0x265   : > { %3032 = vpow2.f32 %v2294_v0  ;;  %v2299_v56 = vadd.f32 %v3009_v49, %v3007_v13  ;;  %v3011_v27 = vpop.eup %3010  ;;  %v2316_v3 = vmul.f32 %v3009_v49, %v4255_v16  ;;  %v2490_v58 = vmul.f32 1.442695, %v2485_v10 }
 0x266   : > { %3034 = vpow2.f32 %v2521_v19  ;;  %v4297_v21 = vpop.eup %3012  ;;  %v2525_v40 = vmul.f32 1.442695, %v2520_v11  ;;  %v2351_v60 = vmul.f32 %v3011_v27, %v4242_v8  ;;  %v2279_v55 = vsel %vm2117_vm5, %v4200_v32, %v4240_v9 }
 0x267   : > { %v4289_v28 = vpop.permute.xlu1 %2433  ;;  %v4291_v59 = vpop.permute.xlu0 %2501  ;;  %3036 = vpow2.f32 %v2329_v36  ;;  %v2334_v24 = vadd.f32 %v3011_v27, %v2299_v56  ;;  %v2319_v51 = vadd.f32 %v2316_v3, %v2284_v52 }
 0x268   : > { %v4301_v30 = vpop.eup %3014  ;;  %3038 = vpow2.f32 %v2397_v12 }
 0x269   : > { %3040 = vpow2.f32 %v2418_v38  ;;  %v2369_v48 = vadd.f32 %v4297_v21, %v2334_v24  ;;  %v2354_v56 = vadd.f32 %v2351_v60, %v2319_v51  ;;  %v2346_v51 = vsel %vm2150_vm8, %v4242_v8, %v4267_v34 }
 0x26a   : > { %v4305_v31 = vpop.eup %3016  ;;  %3042 = vpow2.f32 %v2364_v14 }
 0x26b   : > { %v4309_v23 = vpop.permute.xlu1 %2466  ;;  %v2278_v6 = vpop.permute.xlu0 %2277  ;;  %v2404_v1 = vadd.f32 %v4301_v30, %v2369_v48  ;;  %3044 = vpow2.f32 %v2399_v43 }
 0x26c   : > { %v4312_v46 = vpop.eup %3018  ;;  %3046 = vpow2.f32 %v2420_v35  ;;  %v2280_v14 = vsel %vm2117_vm5, %v4240_v9, %v2278_v6  ;;  %v2386_v35 = vmul.f32 %v4297_v21, %v4279_v37  ;;  %v2311_v6 = vsel %vm2132_vm4, %v4255_v16, %v4221_v20 }
 0x26d   : > { %v2300_v53 = vadd.f32 %v4312_v46, %v4305_v31  ;;  %v4319_v39 = vpop.eup %3020  ;;  %3048 = vpow2.f32 %v2453_v62  ;;  %v2317_v11 = vmul.f32 %v4312_v46, %v2311_v6 }
 0x26e   : > { %v4323_v7 = vpop.eup %3022  ;;  %3050 = vpow2.f32 %v2488_v4  ;;  %v2389_v32 = vadd.f32 %v2386_v35, %v2354_v56 }
 0x26f   : > { %v4327_v50 = vpop.permute.xlu1 %2503  ;;  %v2345_v42 = vpop.permute.xlu0 %2344  ;;  %v2335_v45 = vadd.f32 %v4319_v39, %v2300_v53  ;;  %3052 = vpow2.f32 %v2455_v26  ;;  %v2285_v53 = vmul.f32 %v4305_v31, %v2279_v55  ;;  %v2437_v31 = vsel %vm2192_vm6, %v4269_v47, %v4289_v28 }
 0x270   : > { %v4329_v15 = vpop.eup %3024  ;;  %3054 = vpow2.f32 %v2523_v29  ;;  %v2347_v9 = vsel %vm2150_vm8, %v4267_v34, %v2345_v42  ;;  %v2507_v8 = vsel %vm2228_vm10, %v4291_v59, %v4327_v50  ;;  %v2403_v59 = vld [vmem:[#allocation2 + $0xa0] sm:$0xff] }
 0x271   : > { %v4332_v22 = vpop.eup %3026  ;;  %v2425_v57 = vadd.f32 %v4329_v15, %v2404_v1  ;;  %3056 = vpow2.f32 %v2490_v58  ;;  %v2370_v13 = vadd.f32 %v4323_v7, %v2335_v45 }
 0x272   : > { %v3029_v54 = vpop.eup %3028  ;;  %3058 = vpow2.f32 %v2525_v40  ;;  %v2320_v40 = vadd.f32 %v2317_v11, %v2285_v53 }
 0x273   : > { %v4335_v18 = vpop.eup %3030  ;;  %v2310_v41 = vpop.permute.xlu1 %2309  ;;  %v2460_v0 = vadd.f32 %v4332_v22, %v2425_v57  ;;  %v2286_v10 = vmul.f32 %v3029_v54, %v2280_v14 }
 0x274   : > { %v3033_v63 = vpop.eup %3032  ;;  %v2312_v49 = vsel %vm2132_vm4, %v4221_v20, %v2310_v41  ;;  %v4344_v36 = vpop.permute.xlu0 %2435  ;;  %v3066_v20 = vld [vmem:[#allocation2 + $0x90] sm:$0xff] }
 0x275   : > { %v4339_v19 = vpop.eup %3034  ;;  %v2495_v12 = vadd.f32 %v4335_v18, %v2460_v0  ;;  %v2301_v33 = vadd.f32 %v3033_v63, %v3029_v54  ;;  %v2318_v24 = vmul.f32 %v3033_v63, %v2312_v49  ;;  %v2407_v16 = vmul.f32 %v3066_v20, %v4301_v30 }
 0x276   : > { %v3037_v5 = vpop.eup %3036  ;;  %v2472_v30 = vsel %vm2210_vm7, %v4309_v23, %v4281_v61 }
 0x277   : > { %v4347_v38 = vpop.eup %3038  ;;  %v4352_v44 = vadd.f32 %v4339_v19, %v2495_v12  ;;  %v2336_v27 = vadd.f32 %v3037_v5, %v2301_v33  ;;  %v2380_v48 = vpop.permute.xlu1 %2379  ;;  %v2321_v52 = vadd.f32 %v2318_v24, %v2286_v10  ;;  %v2353_v46 = vmul.f32 %v3037_v5, %v2347_v9 }
 0x278   : > { %v4354_v17 = vpop.eup %3040  ;;  %v2405_v43 = vadd.f32 %v4347_v38, %v2370_v13  ;;  %v4371_v21 = vpop.permute.xlu0 %2505  ;;  %v2382_v58 = vsel %vm2168_vm9, %v4257_v25, %v2380_v48  ;;  %v2410_v41 = vadd.f32 %v2407_v16, %v2389_v32  ;;  %v2352_v33 = vmul.f32 %v4319_v39, %v2346_v51  ;;  %v3067_v32 = vld [vmem:[#allocation2 + $0x98] sm:$0xff] }
 0x279   : > { %v3043_v2 = vpop.eup %3042  ;;  %3060 = vrcp.f32 %v4352_v44  ;;  %v2356_v13 = vadd.f32 %v2353_v46, %v2321_v52  ;;  %v2442_v5 = vmul.f32 %v4329_v15, %v2437_v31  ;;  %v2512_v48 = vmul.f32 %v4335_v18, %v2507_v8 }
 0x27a   : > { %v2371_v62 = vadd.f32 %v3043_v2, %v2336_v27  ;;  %v2426_v4 = vadd.f32 %v4354_v17, %v2405_v43  ;;  %v3045_v1 = vpop.eup %3044  ;;  %v2388_v60 = vmul.f32 %v3043_v2, %v2382_v58  ;;  %v2355_v27 = vadd.f32 %v2352_v33, %v2320_v40 }
 0x27b   : > { %v3047_v26 = vpop.eup %3046  ;;  %v2537_v0 = vpop.permute.xlu1 %2536  ;;  %v2445_v24 = vadd.f32 %v2442_v5, %v2410_v41  ;;  %v2477_v43 = vmul.f32 %v4332_v22, %v2472_v30  ;;  %v2381_v2 = vsel %vm2168_vm9, %v4279_v37, %v4257_v25  ;;  %v2438_v22 = vsel %vm2192_vm6, %v4289_v28, %v4344_v36 }
 0x27c   : > { %v2406_v29 = vadd.f32 %v3045_v1, %v2371_v62  ;;  %v3049_v3 = vpop.eup %3048  ;;  %v2539_v56 = vpop.permute.xlu0 %2538  ;;  %v2391_v55 = vadd.f32 %v2388_v60, %v2356_v13  ;;  %v2387_v35 = vmul.f32 %v4323_v7, %v2381_v2  ;;  %v2409_v62 = vmul.f32 %v3045_v1, %v2403_v59 }
 0x27d   : > { %v4376_v45 = vpop.eup %3050  ;;  %v2461_v57 = vadd.f32 %v3049_v3, %v2426_v4  ;;  %v2542_v39 = vsel %vm2246_vm11, %v2537_v0, %v2539_v56  ;;  %v2480_v25 = vadd.f32 %v2477_v43, %v2445_v24  ;;  %v2408_v9 = vmul.f32 %v3067_v32, %v4347_v38 }
 0x27e   : > { %v2427_v42 = vadd.f32 %v3047_v26, %v2406_v29  ;;  %v3053_v54 = vpop.eup %3052  ;;  %v2390_v4 = vadd.f32 %v2387_v35, %v2355_v27  ;;  %v2547_v37 = vmul.f32 %v4339_v19, %v2542_v39  ;;  %v2412_v11 = vadd.f32 %v2409_v62, %v2391_v55 }
 0x27f   : > { %v3055_v63 = vpop.eup %3054  ;;  %v2496_v47 = vadd.f32 %v4376_v45, %v2461_v57  ;;  %v2471_v6 = vpop.permute.xlu1 %2470  ;;  %v2515_v18 = vadd.f32 %v2512_v48, %v2480_v25  ;;  %v2443_v52 = vmul.f32 %v4354_v17, %v2438_v22  ;;  %v2444_v28 = vmul.f32 %v3047_v26, %v4344_v36 }
 0x280   : > { %v2462_v49 = vadd.f32 %v3053_v54, %v2427_v42  ;;  %v3057_v12 = vpop.eup %3056  ;;  %v2473_v7 = vsel %vm2210_vm7, %v4281_v61, %v2471_v6  ;;  %v2411_v1 = vadd.f32 %v2408_v9, %v2390_v4  ;;  %v2479_v31 = vmul.f32 %v3053_v54, %v2471_v6 }
 0x281   : > { %v2531_v14 = vadd.f32 %v3055_v63, %v2496_v47  ;;  %v3059_v23 = vpop.eup %3058  ;;  %v2550_v20 = vadd.f32 %v2547_v37, %v2515_v18  ;;  %v2478_v16 = vmul.f32 %v3049_v3, %v2473_v7  ;;  %v2447_v19 = vadd.f32 %v2444_v28, %v2412_v11 }
 0x282   : > { %v2497_v34 = vadd.f32 %v3057_v12, %v2462_v49  ;;  %v2508_v61 = vsel %vm2228_vm10, %v4327_v50, %v4371_v21  ;;  %v2514_v3 = vmul.f32 %v3057_v12, %v4371_v21 }
 0x283   : > { %3062 = vrcp.f32 %v2531_v14  ;;  %v2541_v46 = vpop.permute.xlu1 %2540  ;;  %v2482_v38 = vadd.f32 %v2479_v31, %v2447_v19  ;;  %v2513_v36 = vmul.f32 %v4376_v45, %v2508_v61 }
 0x284   : > { %v2532_v15 = vadd.f32 %v3059_v23, %v2497_v34  ;;  %v2543_v17 = vsel %vm2246_vm11, %v2539_v56, %v2541_v46  ;;  %v2549_v0 = vmul.f32 %v3059_v23, %v2541_v46 }
 0x285   : > { %v2548_v51 = vmul.f32 %v3055_v63, %v2543_v17  ;;  %v2517_v30 = vadd.f32 %v2514_v3, %v2482_v38 }
 0x286   : > { %v3061_v10 = vpop.eup %3060  ;;  %3064 = vrcp.f32 %v2532_v15 }
 0x287   : > { %v2556_v53 = vmul.f32 %v3061_v10, %v4352_v44  ;;  %v2446_v44 = vadd.f32 %v2443_v52, %v2411_v1  ;;  %v2552_v33 = vadd.f32 %v2549_v0, %v2517_v30 }
 0x289   : > { %v2559_v29 = vsub.f32 2.0, %v2556_v53  ;;  %v2481_v57 = vadd.f32 %v2478_v16, %v2446_v44 }
 0x28b   : > { %v2562_v58 = vmul.f32 %v3061_v10, %v2559_v29  ;;  %v2516_v54 = vadd.f32 %v2513_v36, %v2481_v57 }
 0x28d   : > { %v2565_v42 = vmul.f32 %v2562_v58, %v2550_v20  ;;  %v2551_v49 = vadd.f32 %v2548_v51, %v2516_v54 }
 0x28f   : > { %2571 = vrot.lane.b32.xlu0 %v2565_v42, %s3101_s22 }
 0x290   : > { %v3063_v26 = vpop.eup %3062 }
 0x291   : > { %v2557_v41 = vmul.f32 %v3063_v26, %v2531_v14 }
 0x293   : > { %v3065_v40 = vpop.eup %3064  ;;  %v2560_v50 = vsub.f32 2.0, %v2557_v41 }
 0x294   : > { %v2558_v13 = vmul.f32 %v3065_v40, %v2532_v15 }
 0x295   : > { %v2563_v47 = vmul.f32 %v3063_v26, %v2560_v50 }
 0x296   : > { %v2561_v60 = vsub.f32 2.0, %v2558_v13 }
 0x297   : > { %v2566_v56 = vmul.f32 %v2563_v47, %v2551_v49 }
 0x298   : > { %v2564_v5 = vmul.f32 %v3065_v40, %v2561_v60 }
 0x299   : > { %2573 = vrot.lane.b32.xlu1 %v2566_v56, %s3101_s22 }
 0x29a   : > { %v2567_v8 = vmul.f32 %v2564_v5, %v2552_v33 }
 0x29c   : > { %2575 = vrot.lane.b32.xlu0 %v2567_v8, %s3101_s22 }
 0x301   : > { %v2572_v21 = vpop.permute.xlu0 %2571 }
 0x30b   : > { %v2574_v45 = vpop.permute.xlu1 %2573 }
 0x30c   : > { %v2577_v12 = vsel %vm2246_vm11, %v2572_v21, %v2574_v45 }
 0x30d   : > { %2582 = vst [vmem:[%s179_s26] sm:$0xff] %v2577_v12 }
 0x30e   : > { %v2576_v63 = vpop.permute.xlu0 %2575 }
 0x30f   : > { %2585 = vst.msk [vmem:[%s179_s26 + $0x10] sm:$0xff] %vm2584_vm12, %v2576_v63  ;;  %v2578_v34 = vsel %vm2246_vm11, %v2574_v45, %v2576_v63 }
 0x310   : > { %2583 = vst [vmem:[%s179_s26 + $0x8] sm:$0xff] %v2578_v34 }
 0x311 PF: > { %s12_s11 = sadd.s32 1, %s3090_s11   ;;  %s4479_s9 = smov %s3086_s10 }
 0x312   : > { %p9_p5 = scmp.ge.s32.totalorder %s12_s11, 4   ;;  %s4480_s10 = smov %s4482_s12 }
 0x314   :  { %11 = sbr.rel (!%p9_p5) target bundleno = 2 (0x2), region = 58 }

</bundles_post_ra>
